<compile_context>
chip_gen: v7x
topology: tpu7x:2x2x1
jax: 0.10.0
libtpu: 0.0.40
codegen_flags: <defaults>
</compile_context>

<pallas_src>
import math
import functools

import jax
import jax.numpy as jnp
from jax import lax
from jax.experimental import pallas as pl
from jax.experimental.pallas import tpu as pltpu


def _global_graph_kernel(x_ref, wq_ref, bq_ref, wk_ref, wv_ref, bv_ref,
                         mask_ref, o_ref, k_scr, v_scr,
                         *, num_heads, head_dim, q_tile):
    """One (batch, q-tile) grid step of the GlobalGraph forward pass.

    x_ref    : (1, S, hidden)  bf16   full sequence for this batch (resident)
    wq/wk/wv : (hidden, H*D)   bf16   fused-head weights (1/sqrt(D) folded in Wq)
    bq/bv    : (1, H*D)        f32    biases (key projection has NO bias)
    mask_ref : (1, tq, S)      int8   raw attention mask (1 = attend, 0 = masked)
    o_ref    : (1, tq, H*D)    f32    lane-dense output
    k_scr/v_scr : (S, H*D)     bf16   per-batch K/V scratch (persist across qi)
    """
    qi = pl.program_id(1)

    # --- K/V projections: once per batch, reused by every q-tile.  The qi
    # axis is "arbitrary" (sequential on one core), so qi == 0 runs first.
    @pl.when(qi == 0)
    def _():
        xkv = x_ref[0]                                             # (S, hidden)
        k_scr[...] = jnp.dot(
            xkv, wk_ref[...], preferred_element_type=jnp.float32
        ).astype(jnp.bfloat16)                                     # no key bias
        v_scr[...] = (
            jnp.dot(xkv, wv_ref[...], preferred_element_type=jnp.float32)
            + bv_ref[...]
        ).astype(jnp.bfloat16)

    # --- Query rows for this tile, sliced from the resident sequence block.
    if q_tile == x_ref.shape[1]:                       # single q-tile per batch
        xq = x_ref[0]
    else:
        row0 = pl.multiple_of(qi * q_tile, q_tile)
        xq = x_ref[0, pl.ds(row0, q_tile), :]          # (tq, hidden) bf16
    q = (jnp.dot(xq, wq_ref[...], preferred_element_type=jnp.float32)
         + bq_ref[...]).astype(jnp.bfloat16)           # (tq, H*D), scale folded

    # Additive mask for this q-tile, rebuilt from the int8 stream (exact for
    # the 0/1 masks this module uses); head-independent, computed once.
    neg_mask = (1.0 - mask_ref[0].astype(jnp.float32)) * (-10000.0)   # (tq, S)

    k = k_scr[...]                                     # (S, H*D) bf16
    v = v_scr[...]

    # TODO(synk): for very long S add a kv-tile grid axis with online (flash)
    # softmax so the (tq, S) score buffers never materialize (v7x 64 MiB VMEM).
    for h in range(num_heads):                         # static, small head loop
        lo = h * head_dim
        hi = lo + head_dim
        # scores = q_h @ k_h^T, contracting on D (no explicit transpose).
        s = lax.dot_general(q[:, lo:hi], k[:, lo:hi],
                            (((1,), (1,)), ((), ())),
                            preferred_element_type=jnp.float32)    # (tq, S)
        s = s + neg_mask

        # Numerically stable softmax in f32.
        # TODO(synk): on v6e/v7x the exp could run in bf16 (~2x EUP); kept f32
        # so the same kernel is also correct/fast on v5e (no bf16 EUP/VPU).
        m = jnp.max(s, axis=-1, keepdims=True)
        e = jnp.exp(s - m)
        p = e * pl.reciprocal(jnp.sum(e, axis=-1, keepdims=True), approx=True)

        ctx = jnp.dot(p.astype(jnp.bfloat16), v[:, lo:hi],
                      preferred_element_type=jnp.float32)          # (tq, D)
        # Store straight into this head's output columns (no concat relayout).
        # TODO(synk): for production D not a multiple of 128, pad D or batch
        # heads in the dot_general to avoid sub-lane slice relayouts.
        o_ref[0, :, lo:hi] = ctx.astype(o_ref.dtype)


def _pick_q_tile(S, B):
    """Choose the query-tile length (sublane dim of the tiled blocks)."""
    del B  # TODO(synk): for B == 1 on v7x, tile qi "parallel" (recompute K/V)
    if S <= 512:
        return S                     # single q-tile per batch
    # Largest divisor of S that is a multiple of 32 (int8 sublane packing) and
    # <= 256, so the per-head (tq, S) f32 score buffers stay bounded.
    for cand in range(256, 31, -32):
        if S % cand == 0:
            return cand
    # TODO(synk): pad S (or use a masked tail q-grid) for awkward lengths.
    return S


def global_graph_forward(hidden_states, attention_mask, params,
                         num_attention_heads, attention_head_size):
    """Pallas implementation of GlobalGraph.forward.

    hidden_states : (B, S, hidden)  float32
    attention_mask: (B, S, S)       float32 (1 = attend, 0 = masked)
    params        : wq/wk/wv (hidden, H*D) math layout, bq/bv (H*D,)
    returns       : (B, S, H*D)     float32
    """
    B, S, hidden = hidden_states.shape
    H, D = num_attention_heads, attention_head_size
    HD = H * D

    # Fold 1/sqrt(D) into the query projection (weights AND bias).
    scale = 1.0 / math.sqrt(D)
    wq = (params["wq"] * scale).astype(jnp.bfloat16)
    bq = (params["bq"] * scale).reshape(1, HD).astype(jnp.float32)
    wk = params["wk"].astype(jnp.bfloat16)
    wv = params["wv"].astype(jnp.bfloat16)
    bv = params["bv"].reshape(1, HD).astype(jnp.float32)

    x_bf16 = hidden_states.astype(jnp.bfloat16)
    # Stream the mask as int8 — 4x fewer HBM bytes than the f32 additive mask.
    mask_i8 = (attention_mask > 0.5).astype(jnp.int8)

    tq = _pick_q_tile(S, B)
    nq = S // tq

    kernel = functools.partial(_global_graph_kernel,
                               num_heads=H, head_dim=D, q_tile=tq)

    # Scoped-VMEM budget derived from the chip, with headroom (<=48 MiB on
    # v7x's 64 MiB, ~96 MiB on v5e/v6e's 128 MiB).
    try:
        vmem_cap = int(pltpu.get_tpu_info().vmem_capacity_bytes)
    except Exception:
        vmem_cap = 64 * 1024 * 1024
    vmem_limit = min(int(0.75 * vmem_cap), 100 * 1024 * 1024)

    def build(const_mode):
        def const_spec(shape):
            idx = lambda b, qi, _n=len(shape): (0,) * _n
            if const_mode is None:
                return pl.BlockSpec(shape, idx)
            return pl.BlockSpec(shape, idx, pipeline_mode=const_mode)

        return pl.pallas_call(
            kernel,
            out_shape=jax.ShapeDtypeStruct((B, S, HD), hidden_states.dtype),
            grid_spec=pltpu.PrefetchScalarGridSpec(
                num_scalar_prefetch=0,
                grid=(B, nq),
                in_specs=[
                    pl.BlockSpec((1, S, hidden), lambda b, qi: (b, 0, 0)),  # x
                    const_spec((hidden, HD)),                               # Wq
                    const_spec((1, HD)),                                    # bq
                    const_spec((hidden, HD)),                               # Wk
                    const_spec((hidden, HD)),                               # Wv
                    const_spec((1, HD)),                                    # bv
                    pl.BlockSpec((1, tq, S), lambda b, qi: (b, qi, 0)),     # mask
                ],
                out_specs=pl.BlockSpec((1, tq, HD), lambda b, qi: (b, qi, 0)),
                scratch_shapes=[pltpu.VMEM((S, HD), jnp.bfloat16),   # K scratch
                                pltpu.VMEM((S, HD), jnp.bfloat16)],  # V scratch
            ),
            compiler_params=pltpu.CompilerParams(
                dimension_semantics=("parallel", "arbitrary"),
                vmem_limit_bytes=vmem_limit),
        )

    args = (x_bf16, wq, bq, wk, wv, bv, mask_i8)
    try:
        # Single-buffer the constant-index weight/bias blocks (pure VMEM
        # saving; matters most on v7x's 64 MiB VMEM, zero perf cost).
        out = build(pl.Buffered(1))(*args)
    except Exception:
        # Fallback for JAX versions without single-buffered pipeline mode.
        out = build(None)(*args)
    return out


def _reference_forward(hidden_states, attention_mask, params, H, D):
    """Pure-JAX f32 reference mirroring the PyTorch module."""
    B, S, hidden = hidden_states.shape
    q = hidden_states @ params["wq"] + params["bq"]
    k = hidden_states @ params["wk"]                    # no bias on key
    v = hidden_states @ params["wv"] + params["bv"]

    def split(x):
        return x.reshape(B, S, H, D).transpose(0, 2, 1, 3)   # (B, H, S, D)

    ql, kl, vl = split(q), split(k), split(v)
    scores = jnp.einsum("bhqd,bhkd->bhqk", ql / math.sqrt(D), kl)
    scores = scores + (1.0 - attention_mask)[:, None, :, :] * (-10000.0)
    probs = jax.nn.softmax(scores, axis=-1)
    ctx = jnp.einsum("bhqk,bhkd->bhqd", probs, vl)
    return ctx.transpose(0, 2, 1, 3).reshape(B, S, H * D)


if __name__ == "__main__":
    B, S, hidden = 2, 8, 32
    num_heads = 2
    head_dim = hidden // num_heads          # attention_head_size = hidden // heads
    HD = num_heads * head_dim

    key = jax.random.PRNGKey(0)
    k_x, k_m, k_wq, k_bq, k_wk, k_wv, k_bv = jax.random.split(key, 7)

    hidden_states = jax.random.normal(k_x, (B, S, hidden), dtype=jnp.float32)
    # attention_mask: 1 = attend, 0 = masked.
    attention_mask = (jax.random.uniform(k_m, (B, S, S)) > 0.2).astype(jnp.float32)

    # "Linear" params in math layout (x @ W + b), heads concatenated along the
    # output dim exactly as nn.Linear(hidden, all_head_size) stores them.
    bound = 1.0 / math.sqrt(hidden)
    params = {
        "wq": jax.random.uniform(k_wq, (hidden, HD), minval=-bound, maxval=bound,
                                 dtype=jnp.float32),
        "bq": jax.random.uniform(k_bq, (HD,), minval=-bound, maxval=bound,
                                 dtype=jnp.float32),
        "wk": jax.random.uniform(k_wk, (hidden, HD), minval=-bound, maxval=bound,
                                 dtype=jnp.float32),
        "wv": jax.random.uniform(k_wv, (hidden, HD), minval=-bound, maxval=bound,
                                 dtype=jnp.float32),
        "bv": jax.random.uniform(k_bv, (HD,), minval=-bound, maxval=bound,
                                 dtype=jnp.float32),
    }

    out = global_graph_forward(hidden_states, attention_mask, params,
                               num_heads, head_dim)
    out = jax.block_until_ready(out)

    ref = _reference_forward(hidden_states, attention_mask, params,
                             num_heads, head_dim)
    assert out.shape == (B, S, HD)
    # Tolerance loosened for bf16 MXU operands + approx reciprocal.
    max_err = float(jnp.max(jnp.abs(out - ref)))
    assert jnp.allclose(out, ref, atol=3e-2, rtol=3e-2), \
        f"mismatch vs reference, max abs err = {max_err}"

    print("KERNEL_OK")
</pallas_src>

<mosaic_0001>
module attributes {stable_mosaic.version = 11 : i64} {
  func.func @_global_graph_kernel(%arg0: i32, %arg1: i32, %arg2: memref<1x8x32xbf16, #tpu.memory_space<vmem>>, %arg3: memref<32x32xbf16, #tpu.memory_space<vmem>>, %arg4: memref<1x32xf32, #tpu.memory_space<vmem>>, %arg5: memref<32x32xbf16, #tpu.memory_space<vmem>>, %arg6: memref<32x32xbf16, #tpu.memory_space<vmem>>, %arg7: memref<1x32xf32, #tpu.memory_space<vmem>>, %arg8: memref<1x8x8xi8, #tpu.memory_space<vmem>>, %arg9: memref<1x8x32xf32, #tpu.memory_space<vmem>>, %arg10: memref<8x32xbf16, #tpu.memory_space<vmem>>, %arg11: memref<8x32xbf16, #tpu.memory_space<vmem>>) attributes {dimension_semantics = [#tpu.dimension_semantics<parallel>, #tpu.dimension_semantics<arbitrary>], iteration_bounds = array<i64: 2, 1>, scalar_prefetch = 0 : i64, scratch_operands = 2 : i64, tpu.core_type = #tpu.core_type<tc>, window_params = [{transform_indices = @transform_0, window_bounds = array<i64: 1, 8, 32>}, {pipeline_mode = #tpu.pipeline_mode<synchronous>, transform_indices = @transform_1, window_bounds = array<i64: 32, 32>}, {pipeline_mode = #tpu.pipeline_mode<synchronous>, transform_indices = @transform_2, window_bounds = array<i64: 1, 32>}, {pipeline_mode = #tpu.pipeline_mode<synchronous>, transform_indices = @transform_3, window_bounds = array<i64: 32, 32>}, {pipeline_mode = #tpu.pipeline_mode<synchronous>, transform_indices = @transform_4, window_bounds = array<i64: 32, 32>}, {pipeline_mode = #tpu.pipeline_mode<synchronous>, transform_indices = @transform_5, window_bounds = array<i64: 1, 32>}, {transform_indices = @transform_6, window_bounds = array<i64: 1, 8, 8>}, {transform_indices = @transform_7, window_bounds = array<i64: 1, 8, 32>}]} {
    %c0_i32 = arith.constant 0 : i32
    %0 = arith.cmpi eq, %arg1, %c0_i32 : i32
    %1 = arith.extui %0 : i1 to i32
    %c0_i32_0 = arith.constant 0 : i32
    %2 = arith.cmpi ne, %1, %c0_i32_0 : i32
    scf.if %2 {
      %c0_29 = arith.constant 0 : index
      %c0_30 = arith.constant 0 : index
      %c0_31 = arith.constant 0 : index
      %60 = vector.load %arg2[%c0_29, %c0_30, %c0_31] : memref<1x8x32xbf16, #tpu.memory_space<vmem>>, vector<1x8x32xbf16>
      %61 = vector.shape_cast %60 : vector<1x8x32xbf16> to vector<8x32xbf16>
      %c0_32 = arith.constant 0 : index
      %c0_33 = arith.constant 0 : index
      %62 = vector.load %arg5[%c0_32, %c0_33] : memref<32x32xbf16, #tpu.memory_space<vmem>>, vector<32x32xbf16>
      %cst_34 = arith.constant dense<0.000000e+00> : vector<8x32xf32>
      %63 = tpu.matmul %61, %62, %cst_34 {dimension_numbers = #tpu.dot_dimension_numbers<[1], [0], [0], [1], [0, 0, 1, 1], [], []>} : vector<8x32xbf16>, vector<32x32xbf16>, vector<8x32xf32> -> vector<8x32xf32>
      %64 = arith.truncf %63 : vector<8x32xf32> to vector<8x32xbf16>
      %c0_35 = arith.constant 0 : index
      %c0_36 = arith.constant 0 : index
      %65 = vector.load %arg10[%c0_35, %c0_36] : memref<8x32xbf16, #tpu.memory_space<vmem>>, vector<8x32xbf16>
      tpu.vector_store %arg10[%c0_35, %c0_36], %64 {strides = array<i32>} : memref<8x32xbf16, #tpu.memory_space<vmem>>, vector<8x32xbf16>,
      %c0_37 = arith.constant 0 : index
      %c0_38 = arith.constant 0 : index
      %66 = vector.load %arg6[%c0_37, %c0_38] : memref<32x32xbf16, #tpu.memory_space<vmem>>, vector<32x32xbf16>
      %cst_39 = arith.constant dense<0.000000e+00> : vector<8x32xf32>
      %67 = tpu.matmul %61, %66, %cst_39 {dimension_numbers = #tpu.dot_dimension_numbers<[1], [0], [0], [1], [0, 0, 1, 1], [], []>} : vector<8x32xbf16>, vector<32x32xbf16>, vector<8x32xf32> -> vector<8x32xf32>
      %c0_40 = arith.constant 0 : index
      %c0_41 = arith.constant 0 : index
      %68 = vector.load %arg7[%c0_40, %c0_41] : memref<1x32xf32, #tpu.memory_space<vmem>>, vector<1x32xf32>
      %69 = vector.broadcast %68 : vector<1x32xf32> to vector<8x32xf32>
      %70 = arith.addf %67, %69 : vector<8x32xf32>
      %71 = arith.truncf %70 : vector<8x32xf32> to vector<8x32xbf16>
      %c0_42 = arith.constant 0 : index
      %c0_43 = arith.constant 0 : index
      %72 = vector.load %arg11[%c0_42, %c0_43] : memref<8x32xbf16, #tpu.memory_space<vmem>>, vector<8x32xbf16>
      tpu.vector_store %arg11[%c0_42, %c0_43], %71 {strides = array<i32>} : memref<8x32xbf16, #tpu.memory_space<vmem>>, vector<8x32xbf16>,
    } else {
    }
    %c0 = arith.constant 0 : index
    %c0_1 = arith.constant 0 : index
    %c0_2 = arith.constant 0 : index
    %3 = vector.load %arg2[%c0, %c0_1, %c0_2] : memref<1x8x32xbf16, #tpu.memory_space<vmem>>, vector<1x8x32xbf16>
    %4 = vector.shape_cast %3 : vector<1x8x32xbf16> to vector<8x32xbf16>
    %c0_3 = arith.constant 0 : index
    %c0_4 = arith.constant 0 : index
    %5 = vector.load %arg3[%c0_3, %c0_4] : memref<32x32xbf16, #tpu.memory_space<vmem>>, vector<32x32xbf16>
    %cst = arith.constant dense<0.000000e+00> : vector<8x32xf32>
    %6 = tpu.matmul %4, %5, %cst {dimension_numbers = #tpu.dot_dimension_numbers<[1], [0], [0], [1], [0, 0, 1, 1], [], []>} : vector<8x32xbf16>, vector<32x32xbf16>, vector<8x32xf32> -> vector<8x32xf32>
    %c0_5 = arith.constant 0 : index
    %c0_6 = arith.constant 0 : index
    %7 = vector.load %arg4[%c0_5, %c0_6] : memref<1x32xf32, #tpu.memory_space<vmem>>, vector<1x32xf32>
    %8 = vector.broadcast %7 : vector<1x32xf32> to vector<8x32xf32>
    %9 = arith.addf %6, %8 : vector<8x32xf32>
    %10 = arith.truncf %9 : vector<8x32xf32> to vector<8x32xbf16>
    %c0_7 = arith.constant 0 : index
    %c0_8 = arith.constant 0 : index
    %c0_9 = arith.constant 0 : index
    %11 = vector.load %arg8[%c0_7, %c0_8, %c0_9] : memref<1x8x8xi8, #tpu.memory_space<vmem>>, vector<1x8x8xi8>
    %12 = vector.shape_cast %11 : vector<1x8x8xi8> to vector<8x8xi8>
    %13 = arith.sitofp %12 : vector<8x8xi8> to vector<8x8xf32>
    %cst_10 = arith.constant 1.000000e+00 : f32
    %14 = vector.broadcast %cst_10 : f32 to vector<8x8xf32>
    %15 = arith.subf %14, %13 : vector<8x8xf32>
    %cst_11 = arith.constant -1.000000e+04 : f32
    %16 = vector.broadcast %cst_11 : f32 to vector<8x8xf32>
    %17 = arith.mulf %15, %16 : vector<8x8xf32>
    %c0_12 = arith.constant 0 : index
    %c0_13 = arith.constant 0 : index
    %18 = vector.load %arg10[%c0_12, %c0_13] : memref<8x32xbf16, #tpu.memory_space<vmem>>, vector<8x32xbf16>
    %c0_14 = arith.constant 0 : index
    %c0_15 = arith.constant 0 : index
    %19 = vector.load %arg11[%c0_14, %c0_15] : memref<8x32xbf16, #tpu.memory_space<vmem>>, vector<8x32xbf16>
    %20 = vector.extract_strided_slice %10 {offsets = [0, 0], sizes = [8, 16], strides = [1, 1]} : vector<8x32xbf16> to vector<8x16xbf16>
    %21 = vector.extract_strided_slice %18 {offsets = [0, 0], sizes = [8, 16], strides = [1, 1]} : vector<8x32xbf16> to vector<8x16xbf16>
    %cst_16 = arith.constant dense<0.000000e+00> : vector<8x8xf32>
    %22 = tpu.matmul %20, %21, %cst_16 {dimension_numbers = #tpu.dot_dimension_numbers<[1], [1], [0], [0], [0, 0, 1, 0], [], []>} : vector<8x16xbf16>, vector<8x16xbf16>, vector<8x8xf32> -> vector<8x8xf32>
    %23 = arith.addf %22, %17 : vector<8x8xf32>
    %cst_17 = arith.constant dense<0xFF800000> : vector<8xf32>
    %24 = vector.multi_reduction <maximumf>, %23, %cst_17 [1] : vector<8x8xf32> to vector<8xf32>
    %25 = vector.shape_cast %24 : vector<8xf32> to vector<8x1xf32>
    %26 = vector.broadcast %25 : vector<8x1xf32> to vector<8x8xf32>
    %27 = arith.subf %23, %26 : vector<8x8xf32>
    %28 = math.exp %27 : vector<8x8xf32>
    %cst_18 = arith.constant dense<0.000000e+00> : vector<8xf32>
    %29 = vector.multi_reduction <add>, %28, %cst_18 [1] : vector<8x8xf32> to vector<8xf32>
    %30 = vector.shape_cast %29 : vector<8xf32> to vector<8x1xf32>
    %31 = tpu.reciprocal %30 {approx = true} : vector<8x1xf32> -> vector<8x1xf32>
    %32 = vector.broadcast %31 : vector<8x1xf32> to vector<8x8xf32>
    %33 = arith.mulf %28, %32 : vector<8x8xf32>
    %34 = arith.truncf %33 : vector<8x8xf32> to vector<8x8xbf16>
    %35 = vector.extract_strided_slice %19 {offsets = [0, 0], sizes = [8, 16], strides = [1, 1]} : vector<8x32xbf16> to vector<8x16xbf16>
    %cst_19 = arith.constant dense<0.000000e+00> : vector<8x16xf32>
    %36 = tpu.matmul %34, %35, %cst_19 {dimension_numbers = #tpu.dot_dimension_numbers<[1], [0], [0], [1], [0, 0, 1, 1], [], []>} : vector<8x8xbf16>, vector<8x16xbf16>, vector<8x16xf32> -> vector<8x16xf32>
    %c0_20 = arith.constant 0 : index
    %c0_21 = arith.constant 0 : index
    %c0_22 = arith.constant 0 : index
    %37 = vector.load %arg9[%c0_20, %c0_21, %c0_22] : memref<1x8x32xf32, #tpu.memory_space<vmem>>, vector<1x8x16xf32>
    %38 = vector.shape_cast %37 : vector<1x8x16xf32> to vector<8x16xf32>
    %39 = vector.shape_cast %36 : vector<8x16xf32> to vector<1x8x16xf32>
    tpu.vector_store %arg9[%c0_20, %c0_21, %c0_22], %39 {strides = array<i32>} : memref<1x8x32xf32, #tpu.memory_space<vmem>>, vector<1x8x16xf32>,
    %40 = vector.extract_strided_slice %10 {offsets = [0, 16], sizes = [8, 16], strides = [1, 1]} : vector<8x32xbf16> to vector<8x16xbf16>
    %41 = vector.extract_strided_slice %18 {offsets = [0, 16], sizes = [8, 16], strides = [1, 1]} : vector<8x32xbf16> to vector<8x16xbf16>
    %cst_23 = arith.constant dense<0.000000e+00> : vector<8x8xf32>
    %42 = tpu.matmul %40, %41, %cst_23 {dimension_numbers = #tpu.dot_dimension_numbers<[1], [1], [0], [0], [0, 0, 1, 0], [], []>} : vector<8x16xbf16>, vector<8x16xbf16>, vector<8x8xf32> -> vector<8x8xf32>
    %43 = arith.addf %42, %17 : vector<8x8xf32>
    %cst_24 = arith.constant dense<0xFF800000> : vector<8xf32>
    %44 = vector.multi_reduction <maximumf>, %43, %cst_24 [1] : vector<8x8xf32> to vector<8xf32>
    %45 = vector.shape_cast %44 : vector<8xf32> to vector<8x1xf32>
    %46 = vector.broadcast %45 : vector<8x1xf32> to vector<8x8xf32>
    %47 = arith.subf %43, %46 : vector<8x8xf32>
    %48 = math.exp %47 : vector<8x8xf32>
    %cst_25 = arith.constant dense<0.000000e+00> : vector<8xf32>
    %49 = vector.multi_reduction <add>, %48, %cst_25 [1] : vector<8x8xf32> to vector<8xf32>
    %50 = vector.shape_cast %49 : vector<8xf32> to vector<8x1xf32>
    %51 = tpu.reciprocal %50 {approx = true} : vector<8x1xf32> -> vector<8x1xf32>
    %52 = vector.broadcast %51 : vector<8x1xf32> to vector<8x8xf32>
    %53 = arith.mulf %48, %52 : vector<8x8xf32>
    %54 = arith.truncf %53 : vector<8x8xf32> to vector<8x8xbf16>
    %55 = vector.extract_strided_slice %19 {offsets = [0, 16], sizes = [8, 16], strides = [1, 1]} : vector<8x32xbf16> to vector<8x16xbf16>
    %cst_26 = arith.constant dense<0.000000e+00> : vector<8x16xf32>
    %56 = tpu.matmul %54, %55, %cst_26 {dimension_numbers = #tpu.dot_dimension_numbers<[1], [0], [0], [1], [0, 0, 1, 1], [], []>} : vector<8x8xbf16>, vector<8x16xbf16>, vector<8x16xf32> -> vector<8x16xf32>
    %c0_27 = arith.constant 0 : index
    %c0_28 = arith.constant 0 : index
    %c16 = arith.constant 16 : index
    %57 = vector.load %arg9[%c0_27, %c0_28, %c16] : memref<1x8x32xf32, #tpu.memory_space<vmem>>, vector<1x8x16xf32>
    %58 = vector.shape_cast %57 : vector<1x8x16xf32> to vector<8x16xf32>
    %59 = vector.shape_cast %56 : vector<8x16xf32> to vector<1x8x16xf32>
    tpu.vector_store %arg9[%c0_27, %c0_28, %c16], %59 {strides = array<i32>} : memref<1x8x32xf32, #tpu.memory_space<vmem>>, vector<1x8x16xf32>,
    return
  }
  func.func @transform_0(%arg0: i32, %arg1: i32) -> (i32, i32, i32) {
    %c0_i32 = arith.constant 0 : i32
    %c0_i32_0 = arith.constant 0 : i32
    %c0_i32_1 = arith.constant 0 : i32
    return %arg0, %c0_i32, %c0_i32_0 : i32, i32, i32
  }
  func.func @transform_1(%arg0: i32, %arg1: i32) -> (i32, i32) {
    %c0_i32 = arith.constant 0 : i32
    %c0_i32_0 = arith.constant 0 : i32
    %c0_i32_1 = arith.constant 0 : i32
    return %c0_i32, %c0_i32_0 : i32, i32
  }
  func.func @transform_2(%arg0: i32, %arg1: i32) -> (i32, i32) {
    %c0_i32 = arith.constant 0 : i32
    %c0_i32_0 = arith.constant 0 : i32
    %c0_i32_1 = arith.constant 0 : i32
    return %c0_i32, %c0_i32_0 : i32, i32
  }
  func.func @transform_3(%arg0: i32, %arg1: i32) -> (i32, i32) {
    %c0_i32 = arith.constant 0 : i32
    %c0_i32_0 = arith.constant 0 : i32
    %c0_i32_1 = arith.constant 0 : i32
    return %c0_i32, %c0_i32_0 : i32, i32
  }
  func.func @transform_4(%arg0: i32, %arg1: i32) -> (i32, i32) {
    %c0_i32 = arith.constant 0 : i32
    %c0_i32_0 = arith.constant 0 : i32
    %c0_i32_1 = arith.constant 0 : i32
    return %c0_i32, %c0_i32_0 : i32, i32
  }
  func.func @transform_5(%arg0: i32, %arg1: i32) -> (i32, i32) {
    %c0_i32 = arith.constant 0 : i32
    %c0_i32_0 = arith.constant 0 : i32
    %c0_i32_1 = arith.constant 0 : i32
    return %c0_i32, %c0_i32_0 : i32, i32
  }
  func.func @transform_6(%arg0: i32, %arg1: i32) -> (i32, i32, i32) {
    %c0_i32 = arith.constant 0 : i32
    %c0_i32_0 = arith.constant 0 : i32
    return %arg0, %arg1, %c0_i32 : i32, i32, i32
  }
  func.func @transform_7(%arg0: i32, %arg1: i32) -> (i32, i32, i32) {
    %c0_i32 = arith.constant 0 : i32
    %c0_i32_0 = arith.constant 0 : i32
    return %arg0, %arg1, %c0_i32 : i32, i32, i32
  }
}

module attributes {stable_mosaic.version = 11 : i64} {
  func.func @_global_graph_kernel(%arg0: i32, %arg1: i32, %arg2: memref<1x8x32xbf16, #tpu.memory_space<vmem>>, %arg3: memref<32x32xbf16, #tpu.memory_space<vmem>>, %arg4: memref<1x32xf32, #tpu.memory_space<vmem>>, %arg5: memref<32x32xbf16, #tpu.memory_space<vmem>>, %arg6: memref<32x32xbf16, #tpu.memory_space<vmem>>, %arg7: memref<1x32xf32, #tpu.memory_space<vmem>>, %arg8: memref<1x8x8xi8, #tpu.memory_space<vmem>>, %arg9: memref<1x8x32xf32, #tpu.memory_space<vmem>>, %arg10: memref<8x32xbf16, #tpu.memory_space<vmem>>, %arg11: memref<8x32xbf16, #tpu.memory_space<vmem>>) attributes {dimension_semantics = [#tpu.dimension_semantics<parallel>, #tpu.dimension_semantics<arbitrary>], iteration_bounds = array<i64: 2, 1>, scalar_prefetch = 0 : i64, scratch_operands = 2 : i64, tpu.core_type = #tpu.core_type<tc>, window_params = [{transform_indices = @transform_0, window_bounds = array<i64: 1, 8, 32>}, {pipeline_mode = #tpu.pipeline_mode<synchronous>, transform_indices = @transform_1, window_bounds = array<i64: 32, 32>}, {pipeline_mode = #tpu.pipeline_mode<synchronous>, transform_indices = @transform_2, window_bounds = array<i64: 1, 32>}, {pipeline_mode = #tpu.pipeline_mode<synchronous>, transform_indices = @transform_3, window_bounds = array<i64: 32, 32>}, {pipeline_mode = #tpu.pipeline_mode<synchronous>, transform_indices = @transform_4, window_bounds = array<i64: 32, 32>}, {pipeline_mode = #tpu.pipeline_mode<synchronous>, transform_indices = @transform_5, window_bounds = array<i64: 1, 32>}, {transform_indices = @transform_6, window_bounds = array<i64: 1, 8, 8>}, {transform_indices = @transform_7, window_bounds = array<i64: 1, 8, 32>}]} {
    %c0_i32 = arith.constant 0 : i32
    %0 = arith.cmpi eq, %arg1, %c0_i32 : i32
    %1 = arith.extui %0 : i1 to i32
    %c0_i32_0 = arith.constant 0 : i32
    %2 = arith.cmpi ne, %1, %c0_i32_0 : i32
    scf.if %2 {
      %c0_29 = arith.constant 0 : index
      %c0_30 = arith.constant 0 : index
      %c0_31 = arith.constant 0 : index
      %60 = vector.load %arg2[%c0_29, %c0_30, %c0_31] : memref<1x8x32xbf16, #tpu.memory_space<vmem>>, vector<1x8x32xbf16>
      %61 = vector.shape_cast %60 : vector<1x8x32xbf16> to vector<8x32xbf16>
      %c0_32 = arith.constant 0 : index
      %c0_33 = arith.constant 0 : index
      %62 = vector.load %arg5[%c0_32, %c0_33] : memref<32x32xbf16, #tpu.memory_space<vmem>>, vector<32x32xbf16>
      %cst_34 = arith.constant dense<0.000000e+00> : vector<8x32xf32>
      %63 = tpu.matmul %61, %62, %cst_34 {dimension_numbers = #tpu.dot_dimension_numbers<[1], [0], [0], [1], [0, 0, 1, 1], [], []>} : vector<8x32xbf16>, vector<32x32xbf16>, vector<8x32xf32> -> vector<8x32xf32>
      %64 = arith.truncf %63 : vector<8x32xf32> to vector<8x32xbf16>
      %c0_35 = arith.constant 0 : index
      %c0_36 = arith.constant 0 : index
      %65 = vector.load %arg10[%c0_35, %c0_36] : memref<8x32xbf16, #tpu.memory_space<vmem>>, vector<8x32xbf16>
      tpu.vector_store %arg10[%c0_35, %c0_36], %64 {strides = array<i32>} : memref<8x32xbf16, #tpu.memory_space<vmem>>, vector<8x32xbf16>,
      %c0_37 = arith.constant 0 : index
      %c0_38 = arith.constant 0 : index
      %66 = vector.load %arg6[%c0_37, %c0_38] : memref<32x32xbf16, #tpu.memory_space<vmem>>, vector<32x32xbf16>
      %cst_39 = arith.constant dense<0.000000e+00> : vector<8x32xf32>
      %67 = tpu.matmul %61, %66, %cst_39 {dimension_numbers = #tpu.dot_dimension_numbers<[1], [0], [0], [1], [0, 0, 1, 1], [], []>} : vector<8x32xbf16>, vector<32x32xbf16>, vector<8x32xf32> -> vector<8x32xf32>
      %c0_40 = arith.constant 0 : index
      %c0_41 = arith.constant 0 : index
      %68 = vector.load %arg7[%c0_40, %c0_41] : memref<1x32xf32, #tpu.memory_space<vmem>>, vector<1x32xf32>
      %69 = vector.broadcast %68 : vector<1x32xf32> to vector<8x32xf32>
      %70 = arith.addf %67, %69 : vector<8x32xf32>
      %71 = arith.truncf %70 : vector<8x32xf32> to vector<8x32xbf16>
      %c0_42 = arith.constant 0 : index
      %c0_43 = arith.constant 0 : index
      %72 = vector.load %arg11[%c0_42, %c0_43] : memref<8x32xbf16, #tpu.memory_space<vmem>>, vector<8x32xbf16>
      tpu.vector_store %arg11[%c0_42, %c0_43], %71 {strides = array<i32>} : memref<8x32xbf16, #tpu.memory_space<vmem>>, vector<8x32xbf16>,
    } else {
    }
    %c0 = arith.constant 0 : index
    %c0_1 = arith.constant 0 : index
    %c0_2 = arith.constant 0 : index
    %3 = vector.load %arg2[%c0, %c0_1, %c0_2] : memref<1x8x32xbf16, #tpu.memory_space<vmem>>, vector<1x8x32xbf16>
    %4 = vector.shape_cast %3 : vector<1x8x32xbf16> to vector<8x32xbf16>
    %c0_3 = arith.constant 0 : index
    %c0_4 = arith.constant 0 : index
    %5 = vector.load %arg3[%c0_3, %c0_4] : memref<32x32xbf16, #tpu.memory_space<vmem>>, vector<32x32xbf16>
    %cst = arith.constant dense<0.000000e+00> : vector<8x32xf32>
    %6 = tpu.matmul %4, %5, %cst {dimension_numbers = #tpu.dot_dimension_numbers<[1], [0], [0], [1], [0, 0, 1, 1], [], []>} : vector<8x32xbf16>, vector<32x32xbf16>, vector<8x32xf32> -> vector<8x32xf32>
    %c0_5 = arith.constant 0 : index
    %c0_6 = arith.constant 0 : index
    %7 = vector.load %arg4[%c0_5, %c0_6] : memref<1x32xf32, #tpu.memory_space<vmem>>, vector<1x32xf32>
    %8 = vector.broadcast %7 : vector<1x32xf32> to vector<8x32xf32>
    %9 = arith.addf %6, %8 : vector<8x32xf32>
    %10 = arith.truncf %9 : vector<8x32xf32> to vector<8x32xbf16>
    %c0_7 = arith.constant 0 : index
    %c0_8 = arith.constant 0 : index
    %c0_9 = arith.constant 0 : index
    %11 = vector.load %arg8[%c0_7, %c0_8, %c0_9] : memref<1x8x8xi8, #tpu.memory_space<vmem>>, vector<1x8x8xi8>
    %12 = vector.shape_cast %11 : vector<1x8x8xi8> to vector<8x8xi8>
    %13 = arith.sitofp %12 : vector<8x8xi8> to vector<8x8xf32>
    %cst_10 = arith.constant 1.000000e+00 : f32
    %14 = vector.broadcast %cst_10 : f32 to vector<8x8xf32>
    %15 = arith.subf %14, %13 : vector<8x8xf32>
    %cst_11 = arith.constant -1.000000e+04 : f32
    %16 = vector.broadcast %cst_11 : f32 to vector<8x8xf32>
    %17 = arith.mulf %15, %16 : vector<8x8xf32>
    %c0_12 = arith.constant 0 : index
    %c0_13 = arith.constant 0 : index
    %18 = vector.load %arg10[%c0_12, %c0_13] : memref<8x32xbf16, #tpu.memory_space<vmem>>, vector<8x32xbf16>
    %c0_14 = arith.constant 0 : index
    %c0_15 = arith.constant 0 : index
    %19 = vector.load %arg11[%c0_14, %c0_15] : memref<8x32xbf16, #tpu.memory_space<vmem>>, vector<8x32xbf16>
    %20 = vector.extract_strided_slice %10 {offsets = [0, 0], sizes = [8, 16], strides = [1, 1]} : vector<8x32xbf16> to vector<8x16xbf16>
    %21 = vector.extract_strided_slice %18 {offsets = [0, 0], sizes = [8, 16], strides = [1, 1]} : vector<8x32xbf16> to vector<8x16xbf16>
    %cst_16 = arith.constant dense<0.000000e+00> : vector<8x8xf32>
    %22 = tpu.matmul %20, %21, %cst_16 {dimension_numbers = #tpu.dot_dimension_numbers<[1], [1], [0], [0], [0, 0, 1, 0], [], []>} : vector<8x16xbf16>, vector<8x16xbf16>, vector<8x8xf32> -> vector<8x8xf32>
    %23 = arith.addf %22, %17 : vector<8x8xf32>
    %cst_17 = arith.constant dense<0xFF800000> : vector<8xf32>
    %24 = vector.multi_reduction <maximumf>, %23, %cst_17 [1] : vector<8x8xf32> to vector<8xf32>
    %25 = vector.shape_cast %24 : vector<8xf32> to vector<8x1xf32>
    %26 = vector.broadcast %25 : vector<8x1xf32> to vector<8x8xf32>
    %27 = arith.subf %23, %26 : vector<8x8xf32>
    %28 = math.exp %27 : vector<8x8xf32>
    %cst_18 = arith.constant dense<0.000000e+00> : vector<8xf32>
    %29 = vector.multi_reduction <add>, %28, %cst_18 [1] : vector<8x8xf32> to vector<8xf32>
    %30 = vector.shape_cast %29 : vector<8xf32> to vector<8x1xf32>
    %31 = tpu.reciprocal %30 {approx = true} : vector<8x1xf32> -> vector<8x1xf32>
    %32 = vector.broadcast %31 : vector<8x1xf32> to vector<8x8xf32>
    %33 = arith.mulf %28, %32 : vector<8x8xf32>
    %34 = arith.truncf %33 : vector<8x8xf32> to vector<8x8xbf16>
    %35 = vector.extract_strided_slice %19 {offsets = [0, 0], sizes = [8, 16], strides = [1, 1]} : vector<8x32xbf16> to vector<8x16xbf16>
    %cst_19 = arith.constant dense<0.000000e+00> : vector<8x16xf32>
    %36 = tpu.matmul %34, %35, %cst_19 {dimension_numbers = #tpu.dot_dimension_numbers<[1], [0], [0], [1], [0, 0, 1, 1], [], []>} : vector<8x8xbf16>, vector<8x16xbf16>, vector<8x16xf32> -> vector<8x16xf32>
    %c0_20 = arith.constant 0 : index
    %c0_21 = arith.constant 0 : index
    %c0_22 = arith.constant 0 : index
    %37 = vector.load %arg9[%c0_20, %c0_21, %c0_22] : memref<1x8x32xf32, #tpu.memory_space<vmem>>, vector<1x8x16xf32>
    %38 = vector.shape_cast %37 : vector<1x8x16xf32> to vector<8x16xf32>
    %39 = vector.shape_cast %36 : vector<8x16xf32> to vector<1x8x16xf32>
    tpu.vector_store %arg9[%c0_20, %c0_21, %c0_22], %39 {strides = array<i32>} : memref<1x8x32xf32, #tpu.memory_space<vmem>>, vector<1x8x16xf32>,
    %40 = vector.extract_strided_slice %10 {offsets = [0, 16], sizes = [8, 16], strides = [1, 1]} : vector<8x32xbf16> to vector<8x16xbf16>
    %41 = vector.extract_strided_slice %18 {offsets = [0, 16], sizes = [8, 16], strides = [1, 1]} : vector<8x32xbf16> to vector<8x16xbf16>
    %cst_23 = arith.constant dense<0.000000e+00> : vector<8x8xf32>
    %42 = tpu.matmul %40, %41, %cst_23 {dimension_numbers = #tpu.dot_dimension_numbers<[1], [1], [0], [0], [0, 0, 1, 0], [], []>} : vector<8x16xbf16>, vector<8x16xbf16>, vector<8x8xf32> -> vector<8x8xf32>
    %43 = arith.addf %42, %17 : vector<8x8xf32>
    %cst_24 = arith.constant dense<0xFF800000> : vector<8xf32>
    %44 = vector.multi_reduction <maximumf>, %43, %cst_24 [1] : vector<8x8xf32> to vector<8xf32>
    %45 = vector.shape_cast %44 : vector<8xf32> to vector<8x1xf32>
    %46 = vector.broadcast %45 : vector<8x1xf32> to vector<8x8xf32>
    %47 = arith.subf %43, %46 : vector<8x8xf32>
    %48 = math.exp %47 : vector<8x8xf32>
    %cst_25 = arith.constant dense<0.000000e+00> : vector<8xf32>
    %49 = vector.multi_reduction <add>, %48, %cst_25 [1] : vector<8x8xf32> to vector<8xf32>
    %50 = vector.shape_cast %49 : vector<8xf32> to vector<8x1xf32>
    %51 = tpu.reciprocal %50 {approx = true} : vector<8x1xf32> -> vector<8x1xf32>
    %52 = vector.broadcast %51 : vector<8x1xf32> to vector<8x8xf32>
    %53 = arith.mulf %48, %52 : vector<8x8xf32>
    %54 = arith.truncf %53 : vector<8x8xf32> to vector<8x8xbf16>
    %55 = vector.extract_strided_slice %19 {offsets = [0, 16], sizes = [8, 16], strides = [1, 1]} : vector<8x32xbf16> to vector<8x16xbf16>
    %cst_26 = arith.constant dense<0.000000e+00> : vector<8x16xf32>
    %56 = tpu.matmul %54, %55, %cst_26 {dimension_numbers = #tpu.dot_dimension_numbers<[1], [0], [0], [1], [0, 0, 1, 1], [], []>} : vector<8x8xbf16>, vector<8x16xbf16>, vector<8x16xf32> -> vector<8x16xf32>
    %c0_27 = arith.constant 0 : index
    %c0_28 = arith.constant 0 : index
    %c16 = arith.constant 16 : index
    %57 = vector.load %arg9[%c0_27, %c0_28, %c16] : memref<1x8x32xf32, #tpu.memory_space<vmem>>, vector<1x8x16xf32>
    %58 = vector.shape_cast %57 : vector<1x8x16xf32> to vector<8x16xf32>
    %59 = vector.shape_cast %56 : vector<8x16xf32> to vector<1x8x16xf32>
    tpu.vector_store %arg9[%c0_27, %c0_28, %c16], %59 {strides = array<i32>} : memref<1x8x32xf32, #tpu.memory_space<vmem>>, vector<1x8x16xf32>,
    return
  }
  func.func @transform_0(%arg0: i32, %arg1: i32) -> (i32, i32, i32) {
    %c0_i32 = arith.constant 0 : i32
    %c0_i32_0 = arith.constant 0 : i32
    %c0_i32_1 = arith.constant 0 : i32
    return %arg0, %c0_i32, %c0_i32_0 : i32, i32, i32
  }
  func.func @transform_1(%arg0: i32, %arg1: i32) -> (i32, i32) {
    %c0_i32 = arith.constant 0 : i32
    %c0_i32_0 = arith.constant 0 : i32
    %c0_i32_1 = arith.constant 0 : i32
    return %c0_i32, %c0_i32_0 : i32, i32
  }
  func.func @transform_2(%arg0: i32, %arg1: i32) -> (i32, i32) {
    %c0_i32 = arith.constant 0 : i32
    %c0_i32_0 = arith.constant 0 : i32
    %c0_i32_1 = arith.constant 0 : i32
    return %c0_i32, %c0_i32_0 : i32, i32
  }
  func.func @transform_3(%arg0: i32, %arg1: i32) -> (i32, i32) {
    %c0_i32 = arith.constant 0 : i32
    %c0_i32_0 = arith.constant 0 : i32
    %c0_i32_1 = arith.constant 0 : i32
    return %c0_i32, %c0_i32_0 : i32, i32
  }
  func.func @transform_4(%arg0: i32, %arg1: i32) -> (i32, i32) {
    %c0_i32 = arith.constant 0 : i32
    %c0_i32_0 = arith.constant 0 : i32
    %c0_i32_1 = arith.constant 0 : i32
    return %c0_i32, %c0_i32_0 : i32, i32
  }
  func.func @transform_5(%arg0: i32, %arg1: i32) -> (i32, i32) {
    %c0_i32 = arith.constant 0 : i32
    %c0_i32_0 = arith.constant 0 : i32
    %c0_i32_1 = arith.constant 0 : i32
    return %c0_i32, %c0_i32_0 : i32, i32
  }
  func.func @transform_6(%arg0: i32, %arg1: i32) -> (i32, i32, i32) {
    %c0_i32 = arith.constant 0 : i32
    %c0_i32_0 = arith.constant 0 : i32
    return %arg0, %arg1, %c0_i32 : i32, i32, i32
  }
  func.func @transform_7(%arg0: i32, %arg1: i32) -> (i32, i32, i32) {
    %c0_i32 = arith.constant 0 : i32
    %c0_i32_0 = arith.constant 0 : i32
    return %arg0, %arg1, %c0_i32 : i32, i32, i32
  }
}

</mosaic_0001>

<bundles_post_ra>
// kernel: tpu_custom_call.1
= control target key start
LH: loop header
LB: loop body
LE: loop exit
PB: predicated region body
PF: predicated region fallthrough
CT: control target
= control target key end

     0   :  { %s1778_s0 = inlined_call_operand.hbm [shape: bf16[2,8,32], index: 0, kind: input, shape index: {}]   ;;  %s1779_s1 = inlined_call_operand.hbm [shape: bf16[32,32], index: 1, kind: input, shape index: {}]   ;;  %s1780_s2 = inlined_call_operand.vmem [shape: f32[1,32], index: 2, kind: input, shape index: {}]   ;;  %s1781_s3 = inlined_call_operand.hbm [shape: bf16[32,32], index: 3, kind: input, shape index: {}]   ;;  %s1782_s4 = inlined_call_operand.hbm [shape: bf16[32,32], index: 4, kind: input, shape index: {}]   ;;  %s1783_s5 = inlined_call_operand.vmem [shape: f32[1,32], index: 5, kind: input, shape index: {}]   ;;  %s1784_s6 = inlined_call_operand.vmem [shape: s8[2,8,8], index: 6, kind: input, shape index: {}]   ;;  %s1785_s7 = inlined_call_operand.hbm [shape: f32[2,8,32], index: 7, kind: output, shape index: {}]  }
   0x1   :  { %1793 = sst [smem:[#allocation19_spill]] %s1784_s6 }
   0x2   :  { %1794 = sst [smem:[#allocation20_spill]] %s1785_s7 }
   0x3   :  { %12 = vsyncpa [#allocation5], 0 }
   0x4   :  { %14 = vsyncpa [#allocation5 + $0x1], 0 }
   0x5   :  { %15 = vsyncpa [#allocation8], 0 }
   0x6   :  { %16 = vsyncpa [#allocation11], 0 }
   0x7   :  { %17 = vsyncpa [#allocation6], 0 }
   0x8   :  { %19 = vsyncpa [#allocation6 + $0x1], 0  ;;  %s1433_s24 = smov 0   ;;  %s1435_s25 = smov 0  }
   0x9   :  { %s1437_s26 = smov 0   ;;  %s1439_s27 = smov 0  }
   0xa   :  { %s1441_s28 = smov 0   ;;  %s1443_s29 = smov 0  }
   0xb LB: > { %1795 = sst [smem:[#allocation17_spill]] %s1360_s24  ;;  %s959_s30 = sadd.s32 4294967295, %s1380_s29   ;;  %s1380_s29 = sphi %s1443_s29, %s25_s29   ;;  %s1376_s28 = sphi %s1441_s28, %s1820_s28   ;;  %s1372_s27 = sphi %s1439_s27, %s1819_s27   ;;  %s1368_s26 = sphi %s1437_s26, %s1818_s26   ;;  %s1364_s25 = sphi %s1435_s25, %s1817_s25   ;;  %s1360_s24 = sphi %s1433_s24, %s1816_s24  }
   0xc   : > { %s960_s8 = sadd.s32 4294967294, %s1380_s29   ;;  %p57_p0 = scmp.ne.s32.totalorder %s1364_s25, %s1360_s24 }
   0xd   : > { %p1467_p1 = scmp.eq.s32.totalorder %s959_s30, 0  ;;  %p1471_p2 = scmp.eq.s32.totalorder %s959_s30, 1 }
   0xe   : > { %p222_p3 = scmp.eq.s32.totalorder %s960_s8, 1  ;;  %p961_p5 = scmp.ge.s32.totalorder %s1380_s29, 1 }
   0xf   : > { %s1796_s9 = scalar_select %p1467_p1, 1, 0 }
  0x10   : > { %s1797_s10 = scalar_select %p1471_p2, 1, 0 }
  0x11   : > { %p1477_p4 = por %p1467_p1, %p57_p0  ;;  %p1482_p6 = por %p222_p3, %p57_p0 }
  0x12   : > { %p229_p7 = scmp.lt.s32.totalorder %s1380_s29, 3  ;;  %s1382_s14 = smov [#allocation7]  }
  0x13   : > { %s1798_s11 = scalar_select %p1477_p4, 1, 0 }
  0x14   : > { %s1799_s12 = scalar_select %p1482_p6, 1, 0 }
  0x15   : > { %p1487_p8 = pnand %p961_p5, %p229_p7  ;;  %s241_s15 = sshll.u32 %s1382_s14, 4  ;;  %s1491_s15 = int_to_ptr.vmem [resolvable:$true] %s241_s15 }
  0x16   : > { %1800 = sst [smem:[#allocation18_spill]] %s1799_s12  ;;  %s1383_s17 = smov [#allocation9]  }
  0x17   : > { %s1801_s13 = scalar_select %p1487_p8, 1, 0 }
  0x18   : > { %p1077_p9 = pneg %p1487_p8  ;;  %s257_s18 = sshll.u32 %s1383_s17, 4  ;;  %s1502_s18 = int_to_ptr.vmem [resolvable:$true] %s257_s18 }
  0x19   : > { %s1384_s19 = smov [#allocation10]   ;;  %s1176_s23 = scalar_lea.hbm %s1779_s1, 256 }
  0x1a   : > { %p1498_p11 = pnand %p1077_p9, %p1467_p1  ;;  %s1504_s20 = sshll.u32 %s1384_s19, 4  ;;  %s271_s20 = int_to_ptr.vmem [resolvable:$true] %s1504_s20 }
  0x1b   : > { %p1177_p12 = scmp.ne.s32.totalorder %s1779_s1, %s1176_s23  ;;  %p1183_p5 = scmp.lt.u32.totalorder %s1176_s23, %s1779_s1 }
  0x1c   : > { %p1514_p13 = pneg %p1498_p11 }
  0x1e   : > { %p1179_p0 = pnand %p1514_p13, %p1177_p12 }
  0x20   : > { %p1180_p3 = pneg %p1179_p0 }
  0x22   : > { %p1185_p7 = pnand %p1183_p5, %p1180_p3 }
  0x24   : > { %1188 = shalt.err (!%p1185_p7)
}
  0x25   : > { %s1189_s21 = scalar_lea.vmem %s1491_s15, 256  ;;  %p1197_p1 = scmp.lt.s32.totalorder %s1491_s15, %s1491_s15 }
  0x26   : > { %p1190_p9 = scmp.ne.s32.totalorder %s1491_s15, %s1189_s21  ;;  %p1198_p4 = scmp.lt.s32.totalorder %s1189_s21, %s1189_s21 }
  0x28   : > { %p1192_p10 = pnand %p1190_p9, %p1514_p13  ;;  %p1199_p12 = por %p1198_p4, %p1197_p1 }
  0x2a   : > { %p1193_p6 = pneg %p1192_p10 }
  0x2c   : > { %p1200_p0 = pnand %p1199_p12, %p1193_p6 }
  0x2e   : > { %1203 = shalt.err (!%p1200_p0)
}
  0x2f   : > { %s1385_s22 = smov 64   ;;  %s1386_s23 = smov 4  }
  0x30   : > { %1080 = dma.hbm_to_vmem [thread:$0]  (!%p1498_p11), %s1779_s1, 256, %s1491_s15, [#allocation8], %s1385_s22, %s1385_s22, %s1386_s23  }
  0x31   : > { %s1204_s21 = scalar_lea.hbm %s1781_s3, 256 }
  0x32   : > { %p1205_p1 = scmp.ne.s32.totalorder %s1781_s3, %s1204_s21  ;;  %p1211_p10 = scmp.lt.u32.totalorder %s1204_s21, %s1781_s3 }
  0x34   : > { %p1207_p4 = pnand %p1205_p1, %p1514_p13 }
  0x36   : > { %p1208_p6 = pneg %p1207_p4 }
  0x38   : > { %p1213_p3 = pnand %p1211_p10, %p1208_p6 }
  0x3a   : > { %1216 = shalt.err (!%p1213_p3)
}
  0x3b   : > { %s1217_s15 = scalar_lea.vmem %s1502_s18, 256  ;;  %p1225_p12 = scmp.lt.s32.totalorder %s1502_s18, %s1502_s18 }
  0x3c   : > { %p1218_p5 = scmp.ne.s32.totalorder %s1502_s18, %s1217_s15  ;;  %p1226_p0 = scmp.lt.s32.totalorder %s1217_s15, %s1217_s15 }
  0x3e   : > { %p1220_p7 = pnand %p1218_p5, %p1514_p13  ;;  %p1227_p1 = por %p1226_p0, %p1225_p12 }
  0x40   : > { %p1221_p9 = pneg %p1220_p7 }
  0x42   : > { %p1228_p4 = pnand %p1227_p1, %p1221_p9 }
  0x44   : > { %1231 = shalt.err (!%p1228_p4)
}
  0x45   : > { %1083 = dma.hbm_to_vmem [thread:$0]  (!%p1498_p11), %s1781_s3, 256, %s1502_s18, [#allocation8], %s1385_s22, %s1385_s22, %s1386_s23  }
  0x46   : > { %s1232_s30 = scalar_lea.hbm %s1782_s4, 256 }
  0x47   : > { %p1233_p6 = scmp.ne.s32.totalorder %s1782_s4, %s1232_s30  ;;  %p1239_p5 = scmp.lt.u32.totalorder %s1232_s30, %s1782_s4 }
  0x49   : > { %p1235_p10 = pnand %p1233_p6, %p1514_p13 }
  0x4b   : > { %p1236_p3 = pneg %p1235_p10 }
  0x4d   : > { %p1241_p7 = pnand %p1239_p5, %p1236_p3 }
  0x4f   : > { %1244 = shalt.err (!%p1241_p7)
}
  0x50   : > { %s1245_s15 = scalar_lea.vmem %s271_s20, 256  ;;  %p1253_p1 = scmp.lt.s32.totalorder %s271_s20, %s271_s20 }
  0x51   : > { %p1246_p9 = scmp.ne.s32.totalorder %s271_s20, %s1245_s15  ;;  %p1254_p4 = scmp.lt.s32.totalorder %s1245_s15, %s1245_s15 }
  0x53   : > { %p1248_p12 = pnand %p1246_p9, %p1514_p13  ;;  %p1255_p8 = por %p1254_p4, %p1253_p1 }
  0x55   : > { %p1249_p0 = pneg %p1248_p12 }
  0x57   : > { %p1256_p2 = pnand %p1255_p8, %p1249_p0 }
  0x59   : > { %1259 = shalt.err (!%p1256_p2)
}
  0x5a   : > { %1086 = dma.hbm_to_vmem [thread:$0]  (!%p1498_p11), %s1782_s4, 256, %s271_s20, [#allocation11], %s1385_s22, %s1385_s22, %s1386_s23  }
  0x5b   : > { %s44_s14 = sadd.s32 1, %s1368_s26  ;;  %s37_s16 = sadd.s32 1, %s1376_s28 }
  0x5c   : > { %p51_p2 = scmp.ne.s32.totalorder %s1368_s26, %s1364_s25  ;;  %p39_p8 = scmp.ge.s32.totalorder %s37_s16, 2 }
  0x5d   : > { %p52_p13 = scmp.eq.s32.totalorder %s1380_s29, 0  ;;  %p1804_p6 = scmp.ne.s32.totalorder %s1797_s10, 0 }
  0x5e   : > { %p1098_p3 = scmp.lt.s32.totalorder %s1380_s29, 2  ;;  %s1822_s16 = smov (%p39_p8, %s37_s16), 0 }
  0x5f   : > { %p1593_p10 = por %p1804_p6, %p51_p2  ;;  %p53_p5 = por %p52_p13, %p51_p2 }
  0x60   : > { %s287_s24 = sand.u32 1, %s1368_s26   ;;  %s41_s12 = ssub.s32 %s1376_s28, %s1822_s16 }
  0x61   : > { %p42_p7 = scmp.eq.s32.totalorder %s41_s12, 0  ;;  %s966_s20 = sshll.u32 %s287_s24, 2 }
  0x62   : > { %s967_s22 = sshll.u32 %s1376_s28, 6  ;;  %s291_s17 = scalar_lea.vmem [#allocation4], %s966_s20 }
  0x63   : > { %s1605_s23 = scalar_select %p42_p7, %s1368_s26, %s44_s14  }
  0x64   : > { %s1610_s10 = scalar_lea.hbm %s1778_s0, %s967_s22  ;;  %s298_s19 = sshll.u32 %s291_s17, 4  ;;  %s1612_s19 = int_to_ptr.vmem [resolvable:$true] %s298_s19 }
  0x65   : > { %p1616_p11 = pnand %p1098_p3, %p53_p5  ;;  %s288_s15 = scalar_lea.sflag [#allocation5], %s287_s24 }
  0x66   : > { %s1260_s18 = scalar_lea.hbm %s1610_s10, 64  ;;  %s1265_s12 = scalar_lea.hbm %s1778_s0, 128 }
  0x67   : > { %p1261_p9 = scmp.ne.s32.totalorder %s1610_s10, %s1260_s18  ;;  %p1262_p12 = pneg %p1616_p11 }
  0x68   : > { %p1266_p4 = scmp.lt.u32.totalorder %s1610_s10, %s1778_s0  ;;  %p1267_p2 = scmp.lt.u32.totalorder %s1265_s12, %s1260_s18 }
  0x69   : > { %p1263_p0 = pnand %p1262_p12, %p1261_p9  ;;  %p1269_p13 = scmp.lt.u32.totalorder %s1260_s18, %s1610_s10 }
  0x6a   : > { %p1268_p8 = por %p1267_p2, %p1266_p4 }
  0x6b   : > { %p1264_p1 = pneg %p1263_p0 }
  0x6c   : > { %p1270_p6 = por %p1269_p13, %p1268_p8 }
  0x6e   : > { %p1271_p3 = pnand %p1270_p6, %p1264_p1 }
  0x70   : > { %1274 = shalt.err (!%p1271_p3)
}
  0x71   : > { %s1275_s24 = scalar_lea.vmem %s1612_s19, 64  ;;  %s1387_s30 = smov [#allocation4]  }
  0x72   : > { %p1276_p5 = scmp.ne.s32.totalorder %s1612_s19, %s1275_s24  ;;  %s1280_s8 = sshll.u32 %s1387_s30, 4  ;;  %s1281_s8 = int_to_ptr.vmem [resolvable:$false] %s1280_s8 }
  0x73   : > { %s1282_s17 = scalar_lea.vmem %s1281_s8, 128  ;;  %p1283_p0 = scmp.lt.s32.totalorder %s1612_s19, %s1281_s8 }
  0x74   : > { %p1278_p7 = pnand %p1276_p5, %p1262_p12  ;;  %p1284_p4 = scmp.lt.s32.totalorder %s1282_s17, %s1275_s24 }
  0x76   : > { %p1279_p9 = pneg %p1278_p7  ;;  %p1285_p2 = por %p1284_p4, %p1283_p0 }
  0x78   : > { %p1286_p8 = pnand %p1285_p2, %p1279_p9 }
  0x7a   : > { %1289 = shalt.err (!%p1286_p8)
}
  0x7b   : > { %1090 = dma.hbm_to_vmem [thread:$0]  (!%p1616_p11), %s1610_s10, 64, %s1612_s19, %s288_s15  }
  0x7c   : > { %p1807_p1 = scmp.ne.s32.totalorder %s1801_s13, 0 }
  0x7d   : > { %s1648_s18 = sand.u32 (!%p1807_p1), 1, %s1364_s25   ;;  %p1808_p12 = scmp.ne.s32.totalorder (!%p1807_p1), %s1798_s11, 0 }
  0x7e   : > { %317 = sbr.rel (%p1807_p1) target bundleno = 1367 (0x557), region = 48  ;;  %s969_s6 = sshll.u32 (!%p1807_p1), %s1648_s18, 2 }
  0x7f   : > { %s320_s14 = scalar_lea.sflag (!%p1807_p1), [#allocation5], %s1648_s18  ;;  %s1652_s12 = scalar_lea.vmem (!%p1807_p1), [#allocation4], %s969_s6 }
  0x85   : > { %1343 = dma.done.wait (%p1808_p12), %s320_s14, 64  }
  0x86   : > { %1345 = vsyncadd (%p1808_p12), %s320_s14, 4294967232  ;;  %p1809_p11 = scmp.ne.s32.totalorder %s1796_s9, 0 }
  0x88   : > { %1347 = dma.done.wait (%p1809_p11), [#allocation8], 512  }
  0x89   : > { %1349 = vsyncadd (%p1809_p11), [#allocation8], 4294966784 }
  0x8a   : > { %1351 = dma.done.wait (%p1809_p11), [#allocation11], 256  }
  0x8b   : > { %1353 = vsyncadd (%p1809_p11), [#allocation11], 4294967040  ;;  %v1388_v0 = vmov 0.0   ;;  %vm1389_vm0 = vmmov 0   ;;  %v1160_v1 = vld [vmem:[#allocation9] sm:$0xff]   ;;  %v1161_v2 = vld [vmem:[#allocation9 + $0x8] sm:$0xff]  }
  0x8c   : > { %1013 = vmatprep.subr.bf16.mxu0 %v1388_v0  ;;  %1017 = vmatprep.mubr.msk.bf16.mxu0 %vm1389_vm0, %v1388_v0  ;;  %v1164_v3 = vld [vmem:[#allocation10] sm:$0xff]   ;;  %v385_v4 = vld [vmem:[%s1652_s12] sm:$0xf]  ;;  %vm402_vm1 = vcmask 261120   ;;  %v1163_v6 = vld [vmem:[#allocation7 + $0x8] sm:$0xff]   ;;  %vm447_vm2 = vcmask 257024  }
  0x8d   : > { %1021 = vmatprep.subr.bf16.mxu1 %v1388_v0  ;;  %1025 = vmatprep.mubr.msk.bf16.mxu1 %vm1389_vm0, %v1388_v0  ;;  %v1162_v5 = vld [vmem:[#allocation7] sm:$0xff]   ;;  %v514_v7 = vld [vmem:[%s1652_s12] sm:$0xf]  ;;  %v1165_v8 = vld [vmem:[#allocation10 + $0x8] sm:$0xff]   ;;  %vm590_vm3 = vcmask 130048   ;;  %s1390_s13 = smov 112  }
  0x8e   : > { %1014 = vmatpush3.bf16.msra.mxu0 %v1160_v1  ;;  %1022 = vmatpush3.bf16.msra.mxu1 %v1164_v3  ;;  %v982_v14 = vld [vmem:[%s1780_s2] ss:$0 sm:$0xff]  ;;  %vm653_vm4 = vcmask 1043456   ;;  %p373_p13 = scmp.lt.s32.totalorder %s1372_s27, 1  ;;  %s1810_s24 = sld [smem:[#allocation19_spill]]  ;;  %vm637_vm5 = vcmask 64512  }
  0x8f   : > { %1015 = vmatprep.subr.bf16.mxu0 %v1388_v0  ;;  %1023 = vmatprep.subr.bf16.mxu1 %v1388_v0  ;;  %v978_v24 = vld [vmem:[%s1783_s5] ss:$0 sm:$0xff]  ;;  %s973_s8 = sshll.u32 %s1648_s18, 3  ;;  %s1391_s6 = smov 16   ;;  %vm819_vm6 = vcmask 261248  }
  0x90   : > { %s374_s21 = scalar_select %p373_p13, %s1372_s27, 1 }
  0x91   : > { %s372_s17 = scalar_lea.vmem [#allocation12], %s973_s8  ;;  %s993_s14 = sshll.u32 %s1372_s27, 7 }
  0x92   : > { %1016 = vmatpush3.bf16.msra.mxu0 %v1161_v2  ;;  %1024 = vmatpush3.bf16.msra.mxu1 %v1165_v8  ;;  %s974_s15 = sshll.u32 %s374_s21, 1  ;;  %s836_s12 = sshll.u32 %s372_s17, 4  ;;  %s1731_s12 = int_to_ptr.vmem [resolvable:$true] %s836_s12 }
  0x93   : > { %1029 = vmatprep.subr.bf16.mxu0 %v1388_v0  ;;  %1037 = vmatprep.subr.bf16.mxu1 %v1388_v0  ;;  %s822_s19 = scalar_lea.sflag [#allocation6], %s1648_s18  ;;  %s1290_s21 = scalar_lea.vmem %s1731_s12, 128 }
  0x94   : > { %s379_s30 = scalar_lea.vmem %s1810_s24, %s974_s15  ;;  %p1291_p6 = scmp.ne.s32.totalorder %s1731_s12, %s1290_s21 }
  0x95   : > { %1018 = vmatmul.mubr.msk.bf16.vlgmr.msra.gmra.mrb[0].mxu0 %vm402_vm1, %v385_v4  ;;  %1026 = vmatmul.mubr.msk.bf16.vlgmr.msra.gmra.mrb[0].mxu1 %vm402_vm1, %v385_v4  ;;  %v583_v36 = vld [vmem:[%s379_s30] sm:$0x3]  ;;  %s1392_s27 = smov [#allocation12]  }
  0x96   : > { %1030 = vmatpush3.bf16.msra.mxu0 %v1162_v5  ;;  %1033 = vmatprep.mubr.msk.bf16.mxu0 %vm1389_vm0, %v1388_v0  ;;  %v584_v37 = vunpack.c.0.s8 %v583_v36  ;;  %p1292_p3 = pnand %p1291_p6, %p1593_p10  ;;  %s1294_s15 = sshll.u32 %s1392_s27, 4  ;;  %s1295_s15 = int_to_ptr.vmem [resolvable:$false] %s1294_s15 }
  0x97   : > { %1031 = vmatprep.subr.bf16.mxu0 %v1388_v0  ;;  %1039 = vmatprep.mubr.msk.bf16.mxu1 %vm1389_vm0, %v1388_v0  ;;  %s1296_s20 = scalar_lea.vmem %s1295_s15, 256  ;;  %p1297_p7 = scmp.lt.s32.totalorder %s1731_s12, %s1295_s15 }
  0x98   : > { %v585_v38 = vcvt.s32.f32 %v584_v37  ;;  %p1293_p5 = pneg %p1292_p3  ;;  %p1298_p9 = scmp.lt.s32.totalorder %s1296_s20, %s1290_s21 }
  0x9a   : > { %1032 = vmatpush3.bf16.msra.mxu0 %v1163_v6  ;;  %v586_v39 = vsub.f32 1.0, %v585_v38  ;;  %p1299_p0 = por %p1298_p9, %p1297_p7 }
  0x9b   : > { %1043 = vmatprep.subr.bf16.mxu0 %v1388_v0 }
  0x9c   : > { %v587_v40 = vmul.f32 -10000.0, %v586_v39  ;;  %p1300_p4 = pnand %p1299_p0, %p1293_p5 }
  0x9d   : > { %1034 = vmatmul.mubr.msk.bf16.vlgmr.msra.gmra.mrb[4].mxu0 %vm402_vm1, %v514_v7 }
  0x9e   : > { %1045 = vmatprep.mubr.msk.bf16.mxu0 %vm1389_vm0, %v1388_v0 }
 0x168   : > { %v440_v9 = vpop.f32.mrb[0].mxu0  ;;  %v506_v25 = vpop.f32.mrb[0].mxu1 }
 0x169   : > { %v446_v10 = vpack.c.bf16 %v440_v9, %v440_v9  ;;  %v1019_v11 = vpop.f32.mrb[1].mxu0  ;;  %v507_v26 = vadd.f32 %v978_v24, %v506_v25  ;;  %v1027_v27 = vpop.f32.mrb[1].mxu1 }
 0x16a   : > { %v443_v12 = vpop.f32.mrb[2].mxu0  ;;  %v509_v28 = vpop.f32.mrb[2].mxu1 }
 0x16b   : > { %448 = vst.msk [vmem:[#allocation2] sm:$0xf] %vm447_vm2, %v446_v10  ;;  %v1020_v13 = vpop.f32.mrb[3].mxu0  ;;  %v512_v29 = vpack.c.bf16 %v507_v26, %v507_v26  ;;  %v1028_v30 = vpop.f32.mrb[3].mxu1 }
 0x16d   : > { %513 = vst.msk [vmem:[#allocation3] sm:$0xf] %vm447_vm2, %v512_v29 }
 0x170   : > { %v576_v15 = vpop.f32.mrb[4].mxu0 }
 0x171   : > { %v1035_v16 = vpop.f32.mrb[5].mxu0  ;;  %v577_v21 = vadd.f32 %v982_v14, %v576_v15 }
 0x172   : > { %v588_v17 = vld [vmem:[#allocation2] sm:$0xf]  ;;  %v579_v18 = vpop.f32.mrb[6].mxu0 }
 0x173   : > { %v595_v19 = vsel %vm590_vm3, %v588_v17, 0  ;;  %v988_v20 = vcombine.low %v588_v17, %v588_v17  ;;  %v1036_v22 = vpop.f32.mrb[7].mxu0  ;;  %v582_v23 = vpack.c.bf16 %v577_v21, %v577_v21 }
 0x174   : > { %1038 = vmatpush3.bf16.xpose.msra.mxu1 %v595_v19  ;;  %v589_v31 = vld [vmem:[#allocation3] sm:$0xf] }
 0x175   : > { %704 = vrot.lane.b32.xlu0 %v988_v20, %s1390_s13  ;;  %1049 = vmatprep.subr.bf16.mxu1 %v1388_v0  ;;  %v655_v32 = vsel %vm653_vm4, %v589_v31, 0  ;;  %v990_v63 = vcombine.low %v589_v31, %v589_v31 }
 0x176   : > { %1044 = vmatpush3.bf16.msra.mxu0 %v655_v32 }
 0x177   : > { %1055 = vmatprep.subr.bf16.mxu0 %v1388_v0 }
 0x179   : > { %699 = vrot.lane.b32.xlu0 %v582_v23, %s1390_s13 }
 0x17b   : > { %1040 = vmatmul.mubr.msk.bf16.vlgmr.msra.gmra.mrb[4].mxu1 %vm590_vm3, %v582_v23 }
 0x17c   : > { %1051 = vmatprep.mubr.msk.bf16.mxu1 %vm1389_vm0, %v1388_v0 }
 0x1e7   : > { %v705_v33 = vpop.permute.xlu0 %704 }
 0x1e8   : > { %v710_v34 = vsel %vm590_vm3, %v705_v33, 0 }
 0x1e9   : > { %1050 = vmatpush3.bf16.xpose.msra.mxu1 %v710_v34 }
 0x1eb   : > { %v700_v35 = vpop.permute.xlu0 %699 }
 0x1f0   : > { %1052 = vmatmul.mubr.msk.bf16.vlgmr.msra.gmra.mrb[8].mxu1 %vm590_vm3, %v700_v35 }
 0x24e   : > { %v631_v41 = vpop.f32.mrb[4].mxu1 }
 0x24f   : > { %v632_v42 = vadd.f32 %v631_v41, %v587_v40  ;;  %v1041_v43 = vpop.f32.mrb[5].mxu1 }
 0x250   : > { %v634_v44 = vpop.f32.mrb[6].mxu1 }
 0x251   : > { %v1042_v45 = vpop.f32.mrb[7].mxu1  ;;  %v638_v46 = vsel %vm637_vm5, %v632_v42, -inf }
 0x252   : > { %639 = vmax.xlane.f32.xlu1 %v638_v46 }
 0x2c3   : > { %v746_v47 = vpop.f32.mrb[8].mxu1 }
 0x2c4   : > { %v747_v48 = vadd.f32 %v746_v47, %v587_v40  ;;  %v1053_v49 = vpop.f32.mrb[9].mxu1 }
 0x2c5   : > { %v749_v50 = vpop.f32.mrb[10].mxu1 }
 0x2c6   : > { %v1054_v51 = vpop.f32.mrb[11].mxu1  ;;  %v752_v52 = vsel %vm637_vm5, %v747_v48, -inf }
 0x2c7   : > { %753 = vmax.xlane.f32.xlu1 %v752_v52 }
 0x2df   : > { %v640_v53 = vpop.xlane.xlu1 %639 }
 0x2e0   : > { %v641_v54 = vsub.f32 %v632_v42, %v640_v53 }
 0x2e2   : > { %v642_v55 = vmul.f32 1.442695, %v641_v54 }
 0x2e4   : > { %1168 = vpow2.f32 %v642_v55 }
 0x2ee   : > { %v1169_v56 = vpop.eup %1168 }
 0x2ef   : > { %v644_v57 = vsel %vm637_vm5, %v1169_v56, 0.0 }
 0x2f0   : > { %645 = vadd.xlane.f32.xlu0 %v644_v57 }
 0x354   : > { %v754_v58 = vpop.xlane.xlu1 %753 }
 0x355   : > { %v755_v59 = vsub.f32 %v747_v48, %v754_v58 }
 0x357   : > { %v756_v60 = vmul.f32 1.442695, %v755_v59 }
 0x359   : > { %1170 = vpow2.f32 %v756_v60 }
 0x363   : > { %v1171_v61 = vpop.eup %1170 }
 0x364   : > { %v758_v62 = vsel %vm637_vm5, %v1171_v61, 0.0 }
 0x365   : > { %759 = vadd.xlane.f32.xlu1 %v758_v62 }
 0x376   : > { %767 = vrot.lane.b32.xlu1 %v990_v63, %s1390_s13  ;;  %s1811_s13 = sld [smem:[#allocation20_spill]] }
 0x37c   : > { %s1729_s10 = scalar_lea.hbm %s1811_s13, %s993_s14 }
 0x37d   : > { %v646_v1 = vpop.xlane.xlu0 %645 }
 0x37e   : > { %1172 = vrcp.f32 %v646_v1 }
 0x388   : > { %v1173_v2 = vpop.eup %1172 }
 0x389   : > { %v648_v3 = vmul.f32 %v1173_v2, %v1169_v56 }
 0x38b   : > { %v649_v4 = vpack.c.bf16 %v648_v3, %v648_v3 }
 0x38d   : > { %1046 = vmatmul.mubr.msk.bf16.vlgmr.msra.gmra.mrb[8].mxu0 %vm637_vm5, %v649_v4 }
 0x38e   : > { %1057 = vmatprep.mubr.msk.bf16.mxu0 %vm1389_vm0, %v1388_v0 }
 0x3f2   : > { %v760_v5 = vpop.xlane.xlu1 %759 }
 0x3f3   : > { %1174 = vrcp.f32 %v760_v5 }
 0x3f6   : > { %v768_v6 = vpop.permute.xlu1 %767 }
 0x3f7   : > { %v773_v7 = vsel %vm653_vm4, %v768_v6, 0 }
 0x3f8   : > { %1056 = vmatpush3.bf16.msra.mxu0 %v773_v7 }
 0x3fd   : > { %v1175_v8 = vpop.eup %1174 }
 0x3fe   : > { %v762_v9 = vmul.f32 %v1175_v8, %v1171_v61 }
 0x400   : > { %v763_v10 = vpack.c.bf16 %v762_v9, %v762_v9 }
 0x402   : > { %1058 = vmatmul.mubr.msk.bf16.vlgmr.msra.gmra.mrb[12].mxu0 %vm637_vm5, %v763_v10 }
 0x460   : > { %v691_v11 = vpop.f32.mrb[8].mxu0 }
 0x461   : > { %697 = vst.msk [vmem:[%s372_s17] sm:$0xff] %vm590_vm3, %v691_v11  ;;  %v1047_v12 = vpop.f32.mrb[9].mxu0 }
 0x462   : > { %v694_v0 = vpop.f32.mrb[10].mxu0 }
 0x463   : > { %v1048_v13 = vpop.f32.mrb[11].mxu0 }
 0x4d5   : > { %v809_v14 = vpop.f32.mrb[12].mxu0 }
 0x4d6   : > { %816 = vrot.lane.b32.xlu1 %v809_v14, %s1391_s6  ;;  %v1059_v15 = vpop.f32.mrb[13].mxu0 }
 0x4d7   : > { %v812_v16 = vpop.f32.mrb[14].mxu0 }
 0x4d8   : > { %v1060_v17 = vpop.f32.mrb[15].mxu0 }
 0x548   : > { %v817_v18 = vpop.permute.xlu1 %816 }
 0x549   : > { %820 = vst.msk [vmem:[%s372_s17] sm:$0xff] %vm819_vm6, %v817_v18 }
 0x54a   : > { %1303 = shalt.err (!%p1300_p4)
}
 0x54b   : > { %s1304_s18 = scalar_lea.hbm %s1729_s10, 128  ;;  %s1308_s30 = scalar_lea.hbm %s1811_s13, 256 }
 0x54c   : > { %p1305_p2 = scmp.ne.s32.totalorder %s1729_s10, %s1304_s18  ;;  %p1309_p12 = scmp.lt.u32.totalorder %s1729_s10, %s1811_s13 }
 0x54d   : > { %p1310_p11 = scmp.lt.u32.totalorder %s1308_s30, %s1304_s18  ;;  %p1312_p6 = scmp.lt.u32.totalorder %s1304_s18, %s1729_s10 }
 0x54e   : > { %p1306_p8 = pnand %p1305_p2, %p1593_p10 }
 0x54f   : > { %p1311_p13 = por %p1310_p11, %p1309_p12 }
 0x550   : > { %p1307_p1 = pneg %p1306_p8 }
 0x551   : > { %p1313_p3 = por %p1312_p6, %p1311_p13 }
 0x553   : > { %p1314_p5 = pnand %p1313_p3, %p1307_p1 }
 0x555   : > { %1317 = shalt.err (!%p1314_p5)
}
 0x556   : > { %1075 = dma.vmem_to_hbm [thread:$0]  (%p1593_p10), %s1731_s12, 128, %s1729_s10, %s822_s19  }
 0x557 PF: > { %s1812_s6 = sld [smem:[#allocation17_spill]]  ;;  %s1813_s14 = sld [smem:[#allocation18_spill]] }
 0x558   : > { %p1815_p9 = scmp.ge.s32.totalorder %s1380_s29, 2 }
 0x55d   : > { %s848_s9 = sand.u32 1, %s1812_s6   ;;  %p1814_p7 = scmp.ne.s32.totalorder %s1813_s14, 0 }
 0x55e   : > { %s849_s11 = scalar_lea.sflag [#allocation6], %s848_s9 }
 0x55f   : > { %p1092_p0 = pnand %p1815_p9, %p1814_p7 }
 0x561   : > { %1355 = dma.done.wait (!%p1092_p0), %s849_s11, 128  }
 0x562   : > { %1357 = vsyncadd (!%p1092_p0), %s849_s11, 4294967168  ;;  %s25_s29 = sadd.s32 1, %s1380_s29   ;;  %s1816_s24 = smov %s1364_s25 }
 0x563   : > { %p22_p4 = scmp.ge.s32.totalorder %s25_s29, 4   ;;  %s1817_s25 = smov %s1368_s26 }
 0x564   : > { %s1818_s26 = smov %s1605_s23  ;;  %s1819_s27 = smov %s1376_s28 }
 0x565   : > { %s1820_s28 = smov %s1822_s16  ;;  %24 = sbr.rel (!%p22_p4) target bundleno = 11 (0xb), region = 112 }
 0x56c   :  { %854 = vsyncpa [#allocation5], 1 }
 0x56d   :  { %856 = vsyncpa [#allocation5 + $0x1], 1 }
 0x56e   :  { %857 = vsyncpa [#allocation8], 1 }
 0x56f   :  { %858 = vsyncpa [#allocation11], 1 }
 0x570   :  { %859 = vsyncpa [#allocation6], 1 }
 0x571   :  { %861 = vsyncpa [#allocation6 + $0x1], 1 }

// kernel: tpu_custom_call.1
= control target key start
LH: loop header
LB: loop body
LE: loop exit
PB: predicated region body
PF: predicated region fallthrough
CT: control target
= control target key end

     0   :  { %s1778_s0 = inlined_call_operand.hbm [shape: bf16[2,8,32], index: 0, kind: input, shape index: {}]   ;;  %s1779_s1 = inlined_call_operand.hbm [shape: bf16[32,32], index: 1, kind: input, shape index: {}]   ;;  %s1780_s2 = inlined_call_operand.vmem [shape: f32[1,32], index: 2, kind: input, shape index: {}]   ;;  %s1781_s3 = inlined_call_operand.hbm [shape: bf16[32,32], index: 3, kind: input, shape index: {}]   ;;  %s1782_s4 = inlined_call_operand.hbm [shape: bf16[32,32], index: 4, kind: input, shape index: {}]   ;;  %s1783_s5 = inlined_call_operand.vmem [shape: f32[1,32], index: 5, kind: input, shape index: {}]   ;;  %s1784_s6 = inlined_call_operand.vmem [shape: s8[2,8,8], index: 6, kind: input, shape index: {}]   ;;  %s1785_s7 = inlined_call_operand.hbm [shape: f32[2,8,32], index: 7, kind: output, shape index: {}]  }
   0x1   :  { %1793 = sst [smem:[#allocation19_spill]] %s1784_s6 }
   0x2   :  { %1794 = sst [smem:[#allocation20_spill]] %s1785_s7 }
   0x3   :  { %12 = vsyncpa [#allocation5], 0 }
   0x4   :  { %14 = vsyncpa [#allocation5 + $0x1], 0 }
   0x5   :  { %15 = vsyncpa [#allocation8], 0 }
   0x6   :  { %16 = vsyncpa [#allocation11], 0 }
   0x7   :  { %17 = vsyncpa [#allocation6], 0 }
   0x8   :  { %19 = vsyncpa [#allocation6 + $0x1], 0  ;;  %s1433_s24 = smov 0   ;;  %s1435_s25 = smov 0  }
   0x9   :  { %s1437_s26 = smov 0   ;;  %s1439_s27 = smov 0  }
   0xa   :  { %s1441_s28 = smov 0   ;;  %s1443_s29 = smov 0  }
   0xb LB: > { %1795 = sst [smem:[#allocation17_spill]] %s1360_s24  ;;  %s959_s30 = sadd.s32 4294967295, %s1380_s29   ;;  %s1380_s29 = sphi %s1443_s29, %s25_s29   ;;  %s1376_s28 = sphi %s1441_s28, %s1820_s28   ;;  %s1372_s27 = sphi %s1439_s27, %s1819_s27   ;;  %s1368_s26 = sphi %s1437_s26, %s1818_s26   ;;  %s1364_s25 = sphi %s1435_s25, %s1817_s25   ;;  %s1360_s24 = sphi %s1433_s24, %s1816_s24  }
   0xc   : > { %s960_s8 = sadd.s32 4294967294, %s1380_s29   ;;  %p57_p0 = scmp.ne.s32.totalorder %s1364_s25, %s1360_s24 }
   0xd   : > { %p1467_p1 = scmp.eq.s32.totalorder %s959_s30, 0  ;;  %p1471_p2 = scmp.eq.s32.totalorder %s959_s30, 1 }
   0xe   : > { %p222_p3 = scmp.eq.s32.totalorder %s960_s8, 1  ;;  %p961_p5 = scmp.ge.s32.totalorder %s1380_s29, 1 }
   0xf   : > { %s1796_s9 = scalar_select %p1467_p1, 1, 0 }
  0x10   : > { %s1797_s10 = scalar_select %p1471_p2, 1, 0 }
  0x11   : > { %p1477_p4 = por %p1467_p1, %p57_p0  ;;  %p1482_p6 = por %p222_p3, %p57_p0 }
  0x12   : > { %p229_p7 = scmp.lt.s32.totalorder %s1380_s29, 3  ;;  %s1382_s14 = smov [#allocation7]  }
  0x13   : > { %s1798_s11 = scalar_select %p1477_p4, 1, 0 }
  0x14   : > { %s1799_s12 = scalar_select %p1482_p6, 1, 0 }
  0x15   : > { %p1487_p8 = pnand %p961_p5, %p229_p7  ;;  %s241_s15 = sshll.u32 %s1382_s14, 4  ;;  %s1491_s15 = int_to_ptr.vmem [resolvable:$true] %s241_s15 }
  0x16   : > { %1800 = sst [smem:[#allocation18_spill]] %s1799_s12  ;;  %s1383_s17 = smov [#allocation9]  }
  0x17   : > { %s1801_s13 = scalar_select %p1487_p8, 1, 0 }
  0x18   : > { %p1077_p9 = pneg %p1487_p8  ;;  %s257_s18 = sshll.u32 %s1383_s17, 4  ;;  %s1502_s18 = int_to_ptr.vmem [resolvable:$true] %s257_s18 }
  0x19   : > { %s1384_s19 = smov [#allocation10]   ;;  %s1176_s23 = scalar_lea.hbm %s1779_s1, 256 }
  0x1a   : > { %p1498_p11 = pnand %p1077_p9, %p1467_p1  ;;  %s1504_s20 = sshll.u32 %s1384_s19, 4  ;;  %s271_s20 = int_to_ptr.vmem [resolvable:$true] %s1504_s20 }
  0x1b   : > { %p1177_p12 = scmp.ne.s32.totalorder %s1779_s1, %s1176_s23  ;;  %p1183_p5 = scmp.lt.u32.totalorder %s1176_s23, %s1779_s1 }
  0x1c   : > { %p1514_p13 = pneg %p1498_p11 }
  0x1e   : > { %p1179_p0 = pnand %p1514_p13, %p1177_p12 }
  0x20   : > { %p1180_p3 = pneg %p1179_p0 }
  0x22   : > { %p1185_p7 = pnand %p1183_p5, %p1180_p3 }
  0x24   : > { %1188 = shalt.err (!%p1185_p7)
}
  0x25   : > { %s1189_s21 = scalar_lea.vmem %s1491_s15, 256  ;;  %p1197_p1 = scmp.lt.s32.totalorder %s1491_s15, %s1491_s15 }
  0x26   : > { %p1190_p9 = scmp.ne.s32.totalorder %s1491_s15, %s1189_s21  ;;  %p1198_p4 = scmp.lt.s32.totalorder %s1189_s21, %s1189_s21 }
  0x28   : > { %p1192_p10 = pnand %p1190_p9, %p1514_p13  ;;  %p1199_p12 = por %p1198_p4, %p1197_p1 }
  0x2a   : > { %p1193_p6 = pneg %p1192_p10 }
  0x2c   : > { %p1200_p0 = pnand %p1199_p12, %p1193_p6 }
  0x2e   : > { %1203 = shalt.err (!%p1200_p0)
}
  0x2f   : > { %s1385_s22 = smov 64   ;;  %s1386_s23 = smov 4  }
  0x30   : > { %1080 = dma.hbm_to_vmem [thread:$0]  (!%p1498_p11), %s1779_s1, 256, %s1491_s15, [#allocation8], %s1385_s22, %s1385_s22, %s1386_s23  }
  0x31   : > { %s1204_s21 = scalar_lea.hbm %s1781_s3, 256 }
  0x32   : > { %p1205_p1 = scmp.ne.s32.totalorder %s1781_s3, %s1204_s21  ;;  %p1211_p10 = scmp.lt.u32.totalorder %s1204_s21, %s1781_s3 }
  0x34   : > { %p1207_p4 = pnand %p1205_p1, %p1514_p13 }
  0x36   : > { %p1208_p6 = pneg %p1207_p4 }
  0x38   : > { %p1213_p3 = pnand %p1211_p10, %p1208_p6 }
  0x3a   : > { %1216 = shalt.err (!%p1213_p3)
}
  0x3b   : > { %s1217_s15 = scalar_lea.vmem %s1502_s18, 256  ;;  %p1225_p12 = scmp.lt.s32.totalorder %s1502_s18, %s1502_s18 }
  0x3c   : > { %p1218_p5 = scmp.ne.s32.totalorder %s1502_s18, %s1217_s15  ;;  %p1226_p0 = scmp.lt.s32.totalorder %s1217_s15, %s1217_s15 }
  0x3e   : > { %p1220_p7 = pnand %p1218_p5, %p1514_p13  ;;  %p1227_p1 = por %p1226_p0, %p1225_p12 }
  0x40   : > { %p1221_p9 = pneg %p1220_p7 }
  0x42   : > { %p1228_p4 = pnand %p1227_p1, %p1221_p9 }
  0x44   : > { %1231 = shalt.err (!%p1228_p4)
}
  0x45   : > { %1083 = dma.hbm_to_vmem [thread:$0]  (!%p1498_p11), %s1781_s3, 256, %s1502_s18, [#allocation8], %s1385_s22, %s1385_s22, %s1386_s23  }
  0x46   : > { %s1232_s30 = scalar_lea.hbm %s1782_s4, 256 }
  0x47   : > { %p1233_p6 = scmp.ne.s32.totalorder %s1782_s4, %s1232_s30  ;;  %p1239_p5 = scmp.lt.u32.totalorder %s1232_s30, %s1782_s4 }
  0x49   : > { %p1235_p10 = pnand %p1233_p6, %p1514_p13 }
  0x4b   : > { %p1236_p3 = pneg %p1235_p10 }
  0x4d   : > { %p1241_p7 = pnand %p1239_p5, %p1236_p3 }
  0x4f   : > { %1244 = shalt.err (!%p1241_p7)
}
  0x50   : > { %s1245_s15 = scalar_lea.vmem %s271_s20, 256  ;;  %p1253_p1 = scmp.lt.s32.totalorder %s271_s20, %s271_s20 }
  0x51   : > { %p1246_p9 = scmp.ne.s32.totalorder %s271_s20, %s1245_s15  ;;  %p1254_p4 = scmp.lt.s32.totalorder %s1245_s15, %s1245_s15 }
  0x53   : > { %p1248_p12 = pnand %p1246_p9, %p1514_p13  ;;  %p1255_p8 = por %p1254_p4, %p1253_p1 }
  0x55   : > { %p1249_p0 = pneg %p1248_p12 }
  0x57   : > { %p1256_p2 = pnand %p1255_p8, %p1249_p0 }
  0x59   : > { %1259 = shalt.err (!%p1256_p2)
}
  0x5a   : > { %1086 = dma.hbm_to_vmem [thread:$0]  (!%p1498_p11), %s1782_s4, 256, %s271_s20, [#allocation11], %s1385_s22, %s1385_s22, %s1386_s23  }
  0x5b   : > { %s44_s14 = sadd.s32 1, %s1368_s26  ;;  %s37_s16 = sadd.s32 1, %s1376_s28 }
  0x5c   : > { %p51_p2 = scmp.ne.s32.totalorder %s1368_s26, %s1364_s25  ;;  %p39_p8 = scmp.ge.s32.totalorder %s37_s16, 2 }
  0x5d   : > { %p52_p13 = scmp.eq.s32.totalorder %s1380_s29, 0  ;;  %p1804_p6 = scmp.ne.s32.totalorder %s1797_s10, 0 }
  0x5e   : > { %p1098_p3 = scmp.lt.s32.totalorder %s1380_s29, 2  ;;  %s1822_s16 = smov (%p39_p8, %s37_s16), 0 }
  0x5f   : > { %p1593_p10 = por %p1804_p6, %p51_p2  ;;  %p53_p5 = por %p52_p13, %p51_p2 }
  0x60   : > { %s287_s24 = sand.u32 1, %s1368_s26   ;;  %s41_s12 = ssub.s32 %s1376_s28, %s1822_s16 }
  0x61   : > { %p42_p7 = scmp.eq.s32.totalorder %s41_s12, 0  ;;  %s966_s20 = sshll.u32 %s287_s24, 2 }
  0x62   : > { %s967_s22 = sshll.u32 %s1376_s28, 6  ;;  %s291_s17 = scalar_lea.vmem [#allocation4], %s966_s20 }
  0x63   : > { %s1605_s23 = scalar_select %p42_p7, %s1368_s26, %s44_s14  }
  0x64   : > { %s1610_s10 = scalar_lea.hbm %s1778_s0, %s967_s22  ;;  %s298_s19 = sshll.u32 %s291_s17, 4  ;;  %s1612_s19 = int_to_ptr.vmem [resolvable:$true] %s298_s19 }
  0x65   : > { %p1616_p11 = pnand %p1098_p3, %p53_p5  ;;  %s288_s15 = scalar_lea.sflag [#allocation5], %s287_s24 }
  0x66   : > { %s1260_s18 = scalar_lea.hbm %s1610_s10, 64  ;;  %s1265_s12 = scalar_lea.hbm %s1778_s0, 128 }
  0x67   : > { %p1261_p9 = scmp.ne.s32.totalorder %s1610_s10, %s1260_s18  ;;  %p1262_p12 = pneg %p1616_p11 }
  0x68   : > { %p1266_p4 = scmp.lt.u32.totalorder %s1610_s10, %s1778_s0  ;;  %p1267_p2 = scmp.lt.u32.totalorder %s1265_s12, %s1260_s18 }
  0x69   : > { %p1263_p0 = pnand %p1262_p12, %p1261_p9  ;;  %p1269_p13 = scmp.lt.u32.totalorder %s1260_s18, %s1610_s10 }
  0x6a   : > { %p1268_p8 = por %p1267_p2, %p1266_p4 }
  0x6b   : > { %p1264_p1 = pneg %p1263_p0 }
  0x6c   : > { %p1270_p6 = por %p1269_p13, %p1268_p8 }
  0x6e   : > { %p1271_p3 = pnand %p1270_p6, %p1264_p1 }
  0x70   : > { %1274 = shalt.err (!%p1271_p3)
}
  0x71   : > { %s1275_s24 = scalar_lea.vmem %s1612_s19, 64  ;;  %s1387_s30 = smov [#allocation4]  }
  0x72   : > { %p1276_p5 = scmp.ne.s32.totalorder %s1612_s19, %s1275_s24  ;;  %s1280_s8 = sshll.u32 %s1387_s30, 4  ;;  %s1281_s8 = int_to_ptr.vmem [resolvable:$false] %s1280_s8 }
  0x73   : > { %s1282_s17 = scalar_lea.vmem %s1281_s8, 128  ;;  %p1283_p0 = scmp.lt.s32.totalorder %s1612_s19, %s1281_s8 }
  0x74   : > { %p1278_p7 = pnand %p1276_p5, %p1262_p12  ;;  %p1284_p4 = scmp.lt.s32.totalorder %s1282_s17, %s1275_s24 }
  0x76   : > { %p1279_p9 = pneg %p1278_p7  ;;  %p1285_p2 = por %p1284_p4, %p1283_p0 }
  0x78   : > { %p1286_p8 = pnand %p1285_p2, %p1279_p9 }
  0x7a   : > { %1289 = shalt.err (!%p1286_p8)
}
  0x7b   : > { %1090 = dma.hbm_to_vmem [thread:$0]  (!%p1616_p11), %s1610_s10, 64, %s1612_s19, %s288_s15  }
  0x7c   : > { %p1807_p1 = scmp.ne.s32.totalorder %s1801_s13, 0 }
  0x7d   : > { %s1648_s18 = sand.u32 (!%p1807_p1), 1, %s1364_s25   ;;  %p1808_p12 = scmp.ne.s32.totalorder (!%p1807_p1), %s1798_s11, 0 }
  0x7e   : > { %317 = sbr.rel (%p1807_p1) target bundleno = 1367 (0x557), region = 48  ;;  %s969_s6 = sshll.u32 (!%p1807_p1), %s1648_s18, 2 }
  0x7f   : > { %s320_s14 = scalar_lea.sflag (!%p1807_p1), [#allocation5], %s1648_s18  ;;  %s1652_s12 = scalar_lea.vmem (!%p1807_p1), [#allocation4], %s969_s6 }
  0x85   : > { %1343 = dma.done.wait (%p1808_p12), %s320_s14, 64  }
  0x86   : > { %1345 = vsyncadd (%p1808_p12), %s320_s14, 4294967232  ;;  %p1809_p11 = scmp.ne.s32.totalorder %s1796_s9, 0 }
  0x88   : > { %1347 = dma.done.wait (%p1809_p11), [#allocation8], 512  }
  0x89   : > { %1349 = vsyncadd (%p1809_p11), [#allocation8], 4294966784 }
  0x8a   : > { %1351 = dma.done.wait (%p1809_p11), [#allocation11], 256  }
  0x8b   : > { %1353 = vsyncadd (%p1809_p11), [#allocation11], 4294967040  ;;  %v1388_v0 = vmov 0.0   ;;  %vm1389_vm0 = vmmov 0   ;;  %v1160_v1 = vld [vmem:[#allocation9] sm:$0xff]   ;;  %v1161_v2 = vld [vmem:[#allocation9 + $0x8] sm:$0xff]  }
  0x8c   : > { %1013 = vmatprep.subr.bf16.mxu0 %v1388_v0  ;;  %1017 = vmatprep.mubr.msk.bf16.mxu0 %vm1389_vm0, %v1388_v0  ;;  %v1164_v3 = vld [vmem:[#allocation10] sm:$0xff]   ;;  %v385_v4 = vld [vmem:[%s1652_s12] sm:$0xf]  ;;  %vm402_vm1 = vcmask 261120   ;;  %v1163_v6 = vld [vmem:[#allocation7 + $0x8] sm:$0xff]   ;;  %vm447_vm2 = vcmask 257024  }
  0x8d   : > { %1021 = vmatprep.subr.bf16.mxu1 %v1388_v0  ;;  %1025 = vmatprep.mubr.msk.bf16.mxu1 %vm1389_vm0, %v1388_v0  ;;  %v1162_v5 = vld [vmem:[#allocation7] sm:$0xff]   ;;  %v514_v7 = vld [vmem:[%s1652_s12] sm:$0xf]  ;;  %v1165_v8 = vld [vmem:[#allocation10 + $0x8] sm:$0xff]   ;;  %vm590_vm3 = vcmask 130048   ;;  %s1390_s13 = smov 112  }
  0x8e   : > { %1014 = vmatpush3.bf16.msra.mxu0 %v1160_v1  ;;  %1022 = vmatpush3.bf16.msra.mxu1 %v1164_v3  ;;  %v982_v14 = vld [vmem:[%s1780_s2] ss:$0 sm:$0xff]  ;;  %vm653_vm4 = vcmask 1043456   ;;  %p373_p13 = scmp.lt.s32.totalorder %s1372_s27, 1  ;;  %s1810_s24 = sld [smem:[#allocation19_spill]]  ;;  %vm637_vm5 = vcmask 64512  }
  0x8f   : > { %1015 = vmatprep.subr.bf16.mxu0 %v1388_v0  ;;  %1023 = vmatprep.subr.bf16.mxu1 %v1388_v0  ;;  %v978_v24 = vld [vmem:[%s1783_s5] ss:$0 sm:$0xff]  ;;  %s973_s8 = sshll.u32 %s1648_s18, 3  ;;  %s1391_s6 = smov 16   ;;  %vm819_vm6 = vcmask 261248  }
  0x90   : > { %s374_s21 = scalar_select %p373_p13, %s1372_s27, 1 }
  0x91   : > { %s372_s17 = scalar_lea.vmem [#allocation12], %s973_s8  ;;  %s993_s14 = sshll.u32 %s1372_s27, 7 }
  0x92   : > { %1016 = vmatpush3.bf16.msra.mxu0 %v1161_v2  ;;  %1024 = vmatpush3.bf16.msra.mxu1 %v1165_v8  ;;  %s974_s15 = sshll.u32 %s374_s21, 1  ;;  %s836_s12 = sshll.u32 %s372_s17, 4  ;;  %s1731_s12 = int_to_ptr.vmem [resolvable:$true] %s836_s12 }
  0x93   : > { %1029 = vmatprep.subr.bf16.mxu0 %v1388_v0  ;;  %1037 = vmatprep.subr.bf16.mxu1 %v1388_v0  ;;  %s822_s19 = scalar_lea.sflag [#allocation6], %s1648_s18  ;;  %s1290_s21 = scalar_lea.vmem %s1731_s12, 128 }
  0x94   : > { %s379_s30 = scalar_lea.vmem %s1810_s24, %s974_s15  ;;  %p1291_p6 = scmp.ne.s32.totalorder %s1731_s12, %s1290_s21 }
  0x95   : > { %1018 = vmatmul.mubr.msk.bf16.vlgmr.msra.gmra.mrb[0].mxu0 %vm402_vm1, %v385_v4  ;;  %1026 = vmatmul.mubr.msk.bf16.vlgmr.msra.gmra.mrb[0].mxu1 %vm402_vm1, %v385_v4  ;;  %v583_v36 = vld [vmem:[%s379_s30] sm:$0x3]  ;;  %s1392_s27 = smov [#allocation12]  }
  0x96   : > { %1030 = vmatpush3.bf16.msra.mxu0 %v1162_v5  ;;  %1033 = vmatprep.mubr.msk.bf16.mxu0 %vm1389_vm0, %v1388_v0  ;;  %v584_v37 = vunpack.c.0.s8 %v583_v36  ;;  %p1292_p3 = pnand %p1291_p6, %p1593_p10  ;;  %s1294_s15 = sshll.u32 %s1392_s27, 4  ;;  %s1295_s15 = int_to_ptr.vmem [resolvable:$false] %s1294_s15 }
  0x97   : > { %1031 = vmatprep.subr.bf16.mxu0 %v1388_v0  ;;  %1039 = vmatprep.mubr.msk.bf16.mxu1 %vm1389_vm0, %v1388_v0  ;;  %s1296_s20 = scalar_lea.vmem %s1295_s15, 256  ;;  %p1297_p7 = scmp.lt.s32.totalorder %s1731_s12, %s1295_s15 }
  0x98   : > { %v585_v38 = vcvt.s32.f32 %v584_v37  ;;  %p1293_p5 = pneg %p1292_p3  ;;  %p1298_p9 = scmp.lt.s32.totalorder %s1296_s20, %s1290_s21 }
  0x9a   : > { %1032 = vmatpush3.bf16.msra.mxu0 %v1163_v6  ;;  %v586_v39 = vsub.f32 1.0, %v585_v38  ;;  %p1299_p0 = por %p1298_p9, %p1297_p7 }
  0x9b   : > { %1043 = vmatprep.subr.bf16.mxu0 %v1388_v0 }
  0x9c   : > { %v587_v40 = vmul.f32 -10000.0, %v586_v39  ;;  %p1300_p4 = pnand %p1299_p0, %p1293_p5 }
  0x9d   : > { %1034 = vmatmul.mubr.msk.bf16.vlgmr.msra.gmra.mrb[4].mxu0 %vm402_vm1, %v514_v7 }
  0x9e   : > { %1045 = vmatprep.mubr.msk.bf16.mxu0 %vm1389_vm0, %v1388_v0 }
 0x168   : > { %v440_v9 = vpop.f32.mrb[0].mxu0  ;;  %v506_v25 = vpop.f32.mrb[0].mxu1 }
 0x169   : > { %v446_v10 = vpack.c.bf16 %v440_v9, %v440_v9  ;;  %v1019_v11 = vpop.f32.mrb[1].mxu0  ;;  %v507_v26 = vadd.f32 %v978_v24, %v506_v25  ;;  %v1027_v27 = vpop.f32.mrb[1].mxu1 }
 0x16a   : > { %v443_v12 = vpop.f32.mrb[2].mxu0  ;;  %v509_v28 = vpop.f32.mrb[2].mxu1 }
 0x16b   : > { %448 = vst.msk [vmem:[#allocation2] sm:$0xf] %vm447_vm2, %v446_v10  ;;  %v1020_v13 = vpop.f32.mrb[3].mxu0  ;;  %v512_v29 = vpack.c.bf16 %v507_v26, %v507_v26  ;;  %v1028_v30 = vpop.f32.mrb[3].mxu1 }
 0x16d   : > { %513 = vst.msk [vmem:[#allocation3] sm:$0xf] %vm447_vm2, %v512_v29 }
 0x170   : > { %v576_v15 = vpop.f32.mrb[4].mxu0 }
 0x171   : > { %v1035_v16 = vpop.f32.mrb[5].mxu0  ;;  %v577_v21 = vadd.f32 %v982_v14, %v576_v15 }
 0x172   : > { %v588_v17 = vld [vmem:[#allocation2] sm:$0xf]  ;;  %v579_v18 = vpop.f32.mrb[6].mxu0 }
 0x173   : > { %v595_v19 = vsel %vm590_vm3, %v588_v17, 0  ;;  %v988_v20 = vcombine.low %v588_v17, %v588_v17  ;;  %v1036_v22 = vpop.f32.mrb[7].mxu0  ;;  %v582_v23 = vpack.c.bf16 %v577_v21, %v577_v21 }
 0x174   : > { %1038 = vmatpush3.bf16.xpose.msra.mxu1 %v595_v19  ;;  %v589_v31 = vld [vmem:[#allocation3] sm:$0xf] }
 0x175   : > { %704 = vrot.lane.b32.xlu0 %v988_v20, %s1390_s13  ;;  %1049 = vmatprep.subr.bf16.mxu1 %v1388_v0  ;;  %v655_v32 = vsel %vm653_vm4, %v589_v31, 0  ;;  %v990_v63 = vcombine.low %v589_v31, %v589_v31 }
 0x176   : > { %1044 = vmatpush3.bf16.msra.mxu0 %v655_v32 }
 0x177   : > { %1055 = vmatprep.subr.bf16.mxu0 %v1388_v0 }
 0x179   : > { %699 = vrot.lane.b32.xlu0 %v582_v23, %s1390_s13 }
 0x17b   : > { %1040 = vmatmul.mubr.msk.bf16.vlgmr.msra.gmra.mrb[4].mxu1 %vm590_vm3, %v582_v23 }
 0x17c   : > { %1051 = vmatprep.mubr.msk.bf16.mxu1 %vm1389_vm0, %v1388_v0 }
 0x1e7   : > { %v705_v33 = vpop.permute.xlu0 %704 }
 0x1e8   : > { %v710_v34 = vsel %vm590_vm3, %v705_v33, 0 }
 0x1e9   : > { %1050 = vmatpush3.bf16.xpose.msra.mxu1 %v710_v34 }
 0x1eb   : > { %v700_v35 = vpop.permute.xlu0 %699 }
 0x1f0   : > { %1052 = vmatmul.mubr.msk.bf16.vlgmr.msra.gmra.mrb[8].mxu1 %vm590_vm3, %v700_v35 }
 0x24e   : > { %v631_v41 = vpop.f32.mrb[4].mxu1 }
 0x24f   : > { %v632_v42 = vadd.f32 %v631_v41, %v587_v40  ;;  %v1041_v43 = vpop.f32.mrb[5].mxu1 }
 0x250   : > { %v634_v44 = vpop.f32.mrb[6].mxu1 }
 0x251   : > { %v1042_v45 = vpop.f32.mrb[7].mxu1  ;;  %v638_v46 = vsel %vm637_vm5, %v632_v42, -inf }
 0x252   : > { %639 = vmax.xlane.f32.xlu1 %v638_v46 }
 0x2c3   : > { %v746_v47 = vpop.f32.mrb[8].mxu1 }
 0x2c4   : > { %v747_v48 = vadd.f32 %v746_v47, %v587_v40  ;;  %v1053_v49 = vpop.f32.mrb[9].mxu1 }
 0x2c5   : > { %v749_v50 = vpop.f32.mrb[10].mxu1 }
 0x2c6   : > { %v1054_v51 = vpop.f32.mrb[11].mxu1  ;;  %v752_v52 = vsel %vm637_vm5, %v747_v48, -inf }
 0x2c7   : > { %753 = vmax.xlane.f32.xlu1 %v752_v52 }
 0x2df   : > { %v640_v53 = vpop.xlane.xlu1 %639 }
 0x2e0   : > { %v641_v54 = vsub.f32 %v632_v42, %v640_v53 }
 0x2e2   : > { %v642_v55 = vmul.f32 1.442695, %v641_v54 }
 0x2e4   : > { %1168 = vpow2.f32 %v642_v55 }
 0x2ee   : > { %v1169_v56 = vpop.eup %1168 }
 0x2ef   : > { %v644_v57 = vsel %vm637_vm5, %v1169_v56, 0.0 }
 0x2f0   : > { %645 = vadd.xlane.f32.xlu0 %v644_v57 }
 0x354   : > { %v754_v58 = vpop.xlane.xlu1 %753 }
 0x355   : > { %v755_v59 = vsub.f32 %v747_v48, %v754_v58 }
 0x357   : > { %v756_v60 = vmul.f32 1.442695, %v755_v59 }
 0x359   : > { %1170 = vpow2.f32 %v756_v60 }
 0x363   : > { %v1171_v61 = vpop.eup %1170 }
 0x364   : > { %v758_v62 = vsel %vm637_vm5, %v1171_v61, 0.0 }
 0x365   : > { %759 = vadd.xlane.f32.xlu1 %v758_v62 }
 0x376   : > { %767 = vrot.lane.b32.xlu1 %v990_v63, %s1390_s13  ;;  %s1811_s13 = sld [smem:[#allocation20_spill]] }
 0x37c   : > { %s1729_s10 = scalar_lea.hbm %s1811_s13, %s993_s14 }
 0x37d   : > { %v646_v1 = vpop.xlane.xlu0 %645 }
 0x37e   : > { %1172 = vrcp.f32 %v646_v1 }
 0x388   : > { %v1173_v2 = vpop.eup %1172 }
 0x389   : > { %v648_v3 = vmul.f32 %v1173_v2, %v1169_v56 }
 0x38b   : > { %v649_v4 = vpack.c.bf16 %v648_v3, %v648_v3 }
 0x38d   : > { %1046 = vmatmul.mubr.msk.bf16.vlgmr.msra.gmra.mrb[8].mxu0 %vm637_vm5, %v649_v4 }
 0x38e   : > { %1057 = vmatprep.mubr.msk.bf16.mxu0 %vm1389_vm0, %v1388_v0 }
 0x3f2   : > { %v760_v5 = vpop.xlane.xlu1 %759 }
 0x3f3   : > { %1174 = vrcp.f32 %v760_v5 }
 0x3f6   : > { %v768_v6 = vpop.permute.xlu1 %767 }
 0x3f7   : > { %v773_v7 = vsel %vm653_vm4, %v768_v6, 0 }
 0x3f8   : > { %1056 = vmatpush3.bf16.msra.mxu0 %v773_v7 }
 0x3fd   : > { %v1175_v8 = vpop.eup %1174 }
 0x3fe   : > { %v762_v9 = vmul.f32 %v1175_v8, %v1171_v61 }
 0x400   : > { %v763_v10 = vpack.c.bf16 %v762_v9, %v762_v9 }
 0x402   : > { %1058 = vmatmul.mubr.msk.bf16.vlgmr.msra.gmra.mrb[12].mxu0 %vm637_vm5, %v763_v10 }
 0x460   : > { %v691_v11 = vpop.f32.mrb[8].mxu0 }
 0x461   : > { %697 = vst.msk [vmem:[%s372_s17] sm:$0xff] %vm590_vm3, %v691_v11  ;;  %v1047_v12 = vpop.f32.mrb[9].mxu0 }
 0x462   : > { %v694_v0 = vpop.f32.mrb[10].mxu0 }
 0x463   : > { %v1048_v13 = vpop.f32.mrb[11].mxu0 }
 0x4d5   : > { %v809_v14 = vpop.f32.mrb[12].mxu0 }
 0x4d6   : > { %816 = vrot.lane.b32.xlu1 %v809_v14, %s1391_s6  ;;  %v1059_v15 = vpop.f32.mrb[13].mxu0 }
 0x4d7   : > { %v812_v16 = vpop.f32.mrb[14].mxu0 }
 0x4d8   : > { %v1060_v17 = vpop.f32.mrb[15].mxu0 }
 0x548   : > { %v817_v18 = vpop.permute.xlu1 %816 }
 0x549   : > { %820 = vst.msk [vmem:[%s372_s17] sm:$0xff] %vm819_vm6, %v817_v18 }
 0x54a   : > { %1303 = shalt.err (!%p1300_p4)
}
 0x54b   : > { %s1304_s18 = scalar_lea.hbm %s1729_s10, 128  ;;  %s1308_s30 = scalar_lea.hbm %s1811_s13, 256 }
 0x54c   : > { %p1305_p2 = scmp.ne.s32.totalorder %s1729_s10, %s1304_s18  ;;  %p1309_p12 = scmp.lt.u32.totalorder %s1729_s10, %s1811_s13 }
 0x54d   : > { %p1310_p11 = scmp.lt.u32.totalorder %s1308_s30, %s1304_s18  ;;  %p1312_p6 = scmp.lt.u32.totalorder %s1304_s18, %s1729_s10 }
 0x54e   : > { %p1306_p8 = pnand %p1305_p2, %p1593_p10 }
 0x54f   : > { %p1311_p13 = por %p1310_p11, %p1309_p12 }
 0x550   : > { %p1307_p1 = pneg %p1306_p8 }
 0x551   : > { %p1313_p3 = por %p1312_p6, %p1311_p13 }
 0x553   : > { %p1314_p5 = pnand %p1313_p3, %p1307_p1 }
 0x555   : > { %1317 = shalt.err (!%p1314_p5)
}
 0x556   : > { %1075 = dma.vmem_to_hbm [thread:$0]  (%p1593_p10), %s1731_s12, 128, %s1729_s10, %s822_s19  }
 0x557 PF: > { %s1812_s6 = sld [smem:[#allocation17_spill]]  ;;  %s1813_s14 = sld [smem:[#allocation18_spill]] }
 0x558   : > { %p1815_p9 = scmp.ge.s32.totalorder %s1380_s29, 2 }
 0x55d   : > { %s848_s9 = sand.u32 1, %s1812_s6   ;;  %p1814_p7 = scmp.ne.s32.totalorder %s1813_s14, 0 }
 0x55e   : > { %s849_s11 = scalar_lea.sflag [#allocation6], %s848_s9 }
 0x55f   : > { %p1092_p0 = pnand %p1815_p9, %p1814_p7 }
 0x561   : > { %1355 = dma.done.wait (!%p1092_p0), %s849_s11, 128  }
 0x562   : > { %1357 = vsyncadd (!%p1092_p0), %s849_s11, 4294967168  ;;  %s25_s29 = sadd.s32 1, %s1380_s29   ;;  %s1816_s24 = smov %s1364_s25 }
 0x563   : > { %p22_p4 = scmp.ge.s32.totalorder %s25_s29, 4   ;;  %s1817_s25 = smov %s1368_s26 }
 0x564   : > { %s1818_s26 = smov %s1605_s23  ;;  %s1819_s27 = smov %s1376_s28 }
 0x565   : > { %s1820_s28 = smov %s1822_s16  ;;  %24 = sbr.rel (!%p22_p4) target bundleno = 11 (0xb), region = 112 }
 0x56c   :  { %854 = vsyncpa [#allocation5], 1 }
 0x56d   :  { %856 = vsyncpa [#allocation5 + $0x1], 1 }
 0x56e   :  { %857 = vsyncpa [#allocation8], 1 }
 0x56f   :  { %858 = vsyncpa [#allocation11], 1 }
 0x570   :  { %859 = vsyncpa [#allocation6], 1 }
 0x571   :  { %861 = vsyncpa [#allocation6 + $0x1], 1 }

</bundles_post_ra>
